<compile_context>
chip_gen: v7x
topology: tpu7x:2x2x1
jax: 0.10.0
libtpu: 0.0.40
codegen_flags: <defaults>
</compile_context>

<pallas_src>
import jax
import jax.numpy as jnp
import numpy as np
from jax.experimental import pallas as pl
from jax.experimental.pallas import tpu as pltpu

_LANE = 128
_SUBLANE = 16  # bf16-friendly batch-tile granularity (also a multiple of 8)


def _round_up(x: int, m: int) -> int:
    return ((x + m - 1) // m) * m


def _make_bc_kernel(n_blocks: int,
                    hidden_dim: int,
                    negative_slope: float = 0.01,
                    eps: float = 1e-5):
    """Fused MLP kernel for a fixed (static) number of Linear+LN+LeakyReLU blocks."""
    inv_d = 1.0 / float(hidden_dim)

    def kernel(obs_ref, *refs):
        # refs = [w_0 .. w_{n_blocks-1}, ln_pack, w_out, b_out, out_ref]
        out_ref = refs[-1]
        b_out_ref = refs[-2]
        w_out_ref = refs[-3]
        ln_ref = refs[-4]
        w_refs = refs[:n_blocks]

        x = obs_ref[...]                       # (TILE_B, obs_dim) bf16

        for li in range(n_blocks):
            # Linear on the MXU: bf16 operands, f32 accumulation.
            y = jnp.dot(x, w_refs[li][...], preferred_element_type=jnp.float32)
            lnp = ln_ref[li]                   # (3, HID_P) f32: bias, gamma, beta
            y = y + lnp[0:1, :]
            # LayerNorm over the TRUE hidden_dim.  Padded columns of y are
            # exactly zero (zero weight cols / zero bias), so the plain sums
            # are correct; var = E[y^2] - mean^2 needs no lane mask.
            mean = jnp.sum(y, axis=-1, keepdims=True) * inv_d
            ex2 = jnp.sum(y * y, axis=-1, keepdims=True) * inv_d
            var = jnp.maximum(ex2 - mean * mean, 0.0)
            yn = (y - mean) * jax.lax.rsqrt(var + eps)
            yn = yn * lnp[1:2, :] + lnp[2:3, :]      # padded gamma/beta = 0
            # LeakyReLU (default negative_slope = 0.01); Dropout = identity (eval).
            act = jnp.where(yn >= 0.0, yn, negative_slope * yn)
            x = act.astype(jnp.bfloat16)       # feed next MXU pass in bf16

        # Final Linear(hidden_dim -> action_dim * 2), lane-dense padded store.
        y = jnp.dot(x, w_out_ref[...], preferred_element_type=jnp.float32)
        out_ref[...] = y + b_out_ref[...]

    return kernel


def init_bc_params(key, obs_dim, action_dim, hidden_dim, n_hidden_layers):
    """Deterministic synthetic parameters (PyTorch-like init, pre-transposed)."""
    params = []
    dims = [(obs_dim, hidden_dim)] + [(hidden_dim, hidden_dim)] * n_hidden_layers
    for (din, dout) in dims:
        key, k1, k2, k3, k4 = jax.random.split(key, 5)
        scale = 1.0 / np.sqrt(din)
        w = jax.random.uniform(k1, (din, dout), jnp.float32, -scale, scale)
        b = jax.random.uniform(k2, (1, dout), jnp.float32, -scale, scale)
        g = jnp.ones((1, dout), jnp.float32) + 0.01 * jax.random.normal(k3, (1, dout))
        be = 0.01 * jax.random.normal(k4, (1, dout), dtype=jnp.float32)
        params += [w, b, g, be]
    key, k1, k2 = jax.random.split(key, 3)
    scale = 1.0 / np.sqrt(hidden_dim)
    w_out = jax.random.uniform(k1, (hidden_dim, action_dim * 2), jnp.float32, -scale, scale)
    b_out = jax.random.uniform(k2, (1, action_dim * 2), jnp.float32, -scale, scale)
    params += [w_out, b_out]
    return params


def bc_policy_forward(obs_batch, params, n_hidden_layers, action_dim, tile_b=None):
    """Run the fused BCPolicy MLP in a single batch-tiled Pallas kernel.

    Returns (mu, log_sigma), the MultivariateGaussian parameters.
    """
    batch, obs_dim = obs_batch.shape
    hidden_dim = params[0].shape[1]
    out_dim = action_dim * 2
    n_blocks = n_hidden_layers + 1

    hid_p = _round_up(hidden_dim, _LANE)
    out_p = _round_up(out_dim, _LANE)   # lane-dense output slab (sliced in wrapper)

    # Batch tile: aim for >= 2 grid steps so ("parallel",) shards across v7x's
    # two TensorCores; cap the tile so very large batches still pipeline.
    if tile_b is None:
        if batch >= 2 * _SUBLANE:
            tile_b = min(1024, _round_up(pl.cdiv(batch, 2), _SUBLANE))
        else:
            tile_b = _round_up(max(batch, 1), _SUBLANE)
    tile_b = max(_SUBLANE, _round_up(int(tile_b), _SUBLANE))
    grid = (pl.cdiv(batch, tile_b),)

    # Observations: no HBM padding pass; single bf16 cast (MXU operand dtype).
    obs_bf16 = obs_batch.astype(jnp.bfloat16)

    # Weights: zero-pad feature dims to lane multiples, cast bf16 (MXU feed).
    # Per-layer (bias, gamma, beta) packed into one (n_blocks, 3, hid_p) f32 slab.
    weights = []
    ln_pack = jnp.zeros((n_blocks, 3, hid_p), jnp.float32)
    idx = 0
    for li in range(n_blocks):
        w, b, g, be = params[idx], params[idx + 1], params[idx + 2], params[idx + 3]
        din = obs_dim if li == 0 else hid_p
        wp = jnp.zeros((din, hid_p), jnp.float32)
        wp = wp.at[:w.shape[0], :hidden_dim].set(w)
        weights.append(wp.astype(jnp.bfloat16))
        ln_pack = ln_pack.at[li, 0, :hidden_dim].set(b[0])
        ln_pack = ln_pack.at[li, 1, :hidden_dim].set(g[0])
        ln_pack = ln_pack.at[li, 2, :hidden_dim].set(be[0])
        idx += 4
    w_out, b_out = params[idx], params[idx + 1]
    w_out_p = jnp.zeros((hid_p, out_p), jnp.float32)
    w_out_p = w_out_p.at[:hidden_dim, :out_dim].set(w_out).astype(jnp.bfloat16)
    b_out_p = jnp.zeros((1, out_p), jnp.float32).at[:, :out_dim].set(b_out)

    const_args = weights + [ln_pack, w_out_p, b_out_p]
    kernel = _make_bc_kernel(n_blocks, hidden_dim)

    # Generation-aware VMEM budget (128 MiB v5e/v6e, 64 MiB/TC v7x).
    try:
        info = pltpu.get_tpu_info()
        vmem_cap = int(getattr(info, "vmem_capacity_bytes", 0)) or (64 << 20)
    except Exception:  # conservative fallback if the query is unavailable
        vmem_cap = 64 << 20
    param_bytes = sum(int(np.prod(a.shape)) * a.dtype.itemsize for a in const_args)
    stream_bytes = tile_b * (obs_dim * 2 + out_p * 4)          # obs bf16 in, out f32
    work_bytes = 4 * tile_b * hid_p * 4                        # f32 temporaries
    need = 2 * param_bytes + 2 * stream_bytes + work_bytes + (8 << 20)
    vmem_limit = int(min(max(need, 32 << 20), max(32 << 20, vmem_cap - (8 << 20))))

    out_spec = pl.BlockSpec((tile_b, out_p), lambda i: (i, 0))

    def _build_in_specs(single_buffer_params: bool):
        extra = {}
        if single_buffer_params:
            # Constant index_maps => params never change across grid steps;
            # single-buffer them to halve their resident VMEM footprint.
            extra = dict(pipeline_mode=pl.Buffered(1))
        specs = [pl.BlockSpec((tile_b, obs_dim), lambda i: (i, 0))]
        for arr in const_args:
            specs.append(
                pl.BlockSpec(arr.shape, (lambda i, _n=arr.ndim: (0,) * _n), **extra))
        return specs

    def _run(single_buffer_params: bool):
        return pl.pallas_call(
            kernel,
            out_shape=jax.ShapeDtypeStruct((batch, out_p), jnp.float32),
            grid=grid,
            in_specs=_build_in_specs(single_buffer_params),
            out_specs=out_spec,
            compiler_params=pltpu.CompilerParams(
                dimension_semantics=("parallel",),
                vmem_limit_bytes=vmem_limit),
        )(obs_bf16, *const_args)

    try:
        out = _run(True)
    except Exception:
        # Fallback: default double-buffered params if Buffered(1) is rejected.
        out = _run(False)

    out = out[:, :out_dim]
    mu = out[:, :action_dim]
    log_sigma = out[:, action_dim:]
    return mu, log_sigma


def _reference_forward(obs, params, n_hidden_layers, action_dim,
                       eps=1e-5, slope=0.01, bf16_matmul=True):
    """Pure-JAX reference (same bf16-MXU matmul convention as the kernel)."""
    def mm(x, w):
        if bf16_matmul:
            return jnp.dot(x.astype(jnp.bfloat16), w.astype(jnp.bfloat16),
                           preferred_element_type=jnp.float32)
        return jnp.dot(x, w)

    x = obs.astype(jnp.float32)
    idx = 0
    for _ in range(n_hidden_layers + 1):
        w, b, g, be = params[idx], params[idx + 1], params[idx + 2], params[idx + 3]
        y = mm(x, w) + b
        m = jnp.mean(y, axis=-1, keepdims=True)
        v = jnp.mean((y - m) ** 2, axis=-1, keepdims=True)
        yn = (y - m) * jax.lax.rsqrt(v + eps) * g + be
        x = jnp.where(yn >= 0, yn, slope * yn)
        idx += 4
    out = mm(x, params[idx]) + params[idx + 1]
    return out[:, :action_dim], out[:, action_dim:]


if __name__ == "__main__":
    # Small, module-consistent shapes.
    batch = 8
    obs_dim = 16
    action_dim = 4
    hidden_dim = 32
    n_hidden_layers = 2
    # dropout_rate irrelevant at inference (identity).

    key = jax.random.PRNGKey(0)
    key, k_obs = jax.random.split(key)
    obs = jax.random.normal(k_obs, (batch, obs_dim), dtype=jnp.float32)

    params = init_bc_params(key, obs_dim, action_dim, hidden_dim, n_hidden_layers)

    mu, log_sigma = bc_policy_forward(obs, params, n_hidden_layers, action_dim)
    jax.block_until_ready((mu, log_sigma))

    mu_ref, ls_ref = _reference_forward(obs, params, n_hidden_layers, action_dim)
    np.testing.assert_allclose(np.asarray(mu), np.asarray(mu_ref),
                               rtol=1e-2, atol=2e-2)
    np.testing.assert_allclose(np.asarray(log_sigma), np.asarray(ls_ref),
                               rtol=1e-2, atol=2e-2)

    print("KERNEL_OK")
</pallas_src>

<mosaic_0001>
module attributes {stable_mosaic.version = 11 : i64} {
  func.func @kernel(%arg0: i32, %arg1: memref<16x16xbf16, #tpu.memory_space<vmem>>, %arg2: memref<16x128xbf16, #tpu.memory_space<vmem>>, %arg3: memref<128x128xbf16, #tpu.memory_space<vmem>>, %arg4: memref<128x128xbf16, #tpu.memory_space<vmem>>, %arg5: memref<3x3x128xf32, #tpu.memory_space<vmem>>, %arg6: memref<128x128xbf16, #tpu.memory_space<vmem>>, %arg7: memref<1x128xf32, #tpu.memory_space<vmem>>, %arg8: memref<16x128xf32, #tpu.memory_space<vmem>>) attributes {dimension_semantics = [#tpu.dimension_semantics<parallel>], iteration_bounds = array<i64: 1>, scalar_prefetch = 0 : i64, scratch_operands = 0 : i64, tpu.core_type = #tpu.core_type<tc>, window_params = [{transform_indices = @transform_0, window_bounds = array<i64: 16, 16>}, {pipeline_mode = #tpu.pipeline_mode<synchronous>, transform_indices = @transform_1, window_bounds = array<i64: 16, 128>}, {pipeline_mode = #tpu.pipeline_mode<synchronous>, transform_indices = @transform_2, window_bounds = array<i64: 128, 128>}, {pipeline_mode = #tpu.pipeline_mode<synchronous>, transform_indices = @transform_3, window_bounds = array<i64: 128, 128>}, {pipeline_mode = #tpu.pipeline_mode<synchronous>, transform_indices = @transform_4, window_bounds = array<i64: 3, 3, 128>}, {pipeline_mode = #tpu.pipeline_mode<synchronous>, transform_indices = @transform_5, window_bounds = array<i64: 128, 128>}, {pipeline_mode = #tpu.pipeline_mode<synchronous>, transform_indices = @transform_6, window_bounds = array<i64: 1, 128>}, {transform_indices = @transform_7, window_bounds = array<i64: 16, 128>}]} {
    %c0 = arith.constant 0 : index
    %c0_0 = arith.constant 0 : index
    %0 = vector.load %arg1[%c0, %c0_0] : memref<16x16xbf16, #tpu.memory_space<vmem>>, vector<16x16xbf16>
    %c0_1 = arith.constant 0 : index
    %c0_2 = arith.constant 0 : index
    %1 = vector.load %arg2[%c0_1, %c0_2] : memref<16x128xbf16, #tpu.memory_space<vmem>>, vector<16x128xbf16>
    %cst = arith.constant dense<0.000000e+00> : vector<16x128xf32>
    %2 = tpu.matmul %0, %1, %cst {dimension_numbers = #tpu.dot_dimension_numbers<[1], [0], [0], [1], [0, 0, 1, 1], [], []>} : vector<16x16xbf16>, vector<16x128xbf16>, vector<16x128xf32> -> vector<16x128xf32>
    %c0_3 = arith.constant 0 : index
    %c0_4 = arith.constant 0 : index
    %c0_5 = arith.constant 0 : index
    %3 = vector.load %arg5[%c0_3, %c0_4, %c0_5] : memref<3x3x128xf32, #tpu.memory_space<vmem>>, vector<1x3x128xf32>
    %4 = vector.shape_cast %3 : vector<1x3x128xf32> to vector<3x128xf32>
    %5 = vector.extract_strided_slice %4 {offsets = [0, 0], sizes = [1, 128], strides = [1, 1]} : vector<3x128xf32> to vector<1x128xf32>
    %6 = vector.broadcast %5 : vector<1x128xf32> to vector<16x128xf32>
    %7 = arith.addf %2, %6 : vector<16x128xf32>
    %cst_6 = arith.constant dense<0.000000e+00> : vector<16xf32>
    %8 = vector.multi_reduction <add>, %7, %cst_6 [1] : vector<16x128xf32> to vector<16xf32>
    %9 = vector.shape_cast %8 : vector<16xf32> to vector<16x1xf32>
    %cst_7 = arith.constant 3.125000e-02 : f32
    %10 = vector.broadcast %cst_7 : f32 to vector<16x1xf32>
    %11 = arith.mulf %9, %10 : vector<16x1xf32>
    %12 = arith.mulf %7, %7 : vector<16x128xf32>
    %cst_8 = arith.constant dense<0.000000e+00> : vector<16xf32>
    %13 = vector.multi_reduction <add>, %12, %cst_8 [1] : vector<16x128xf32> to vector<16xf32>
    %14 = vector.shape_cast %13 : vector<16xf32> to vector<16x1xf32>
    %cst_9 = arith.constant 3.125000e-02 : f32
    %15 = vector.broadcast %cst_9 : f32 to vector<16x1xf32>
    %16 = arith.mulf %14, %15 : vector<16x1xf32>
    %17 = arith.mulf %11, %11 : vector<16x1xf32>
    %18 = arith.subf %16, %17 : vector<16x1xf32>
    %cst_10 = arith.constant 0.000000e+00 : f32
    %19 = vector.broadcast %cst_10 : f32 to vector<16x1xf32>
    %20 = arith.maximumf %18, %19 : vector<16x1xf32>
    %21 = vector.broadcast %11 : vector<16x1xf32> to vector<16x128xf32>
    %22 = arith.subf %7, %21 : vector<16x128xf32>
    %cst_11 = arith.constant 9.99999974E-6 : f32
    %23 = vector.broadcast %cst_11 : f32 to vector<16x1xf32>
    %24 = arith.addf %20, %23 : vector<16x1xf32>
    %25 = math.rsqrt %24 : vector<16x1xf32>
    %26 = vector.broadcast %25 : vector<16x1xf32> to vector<16x128xf32>
    %27 = arith.mulf %22, %26 : vector<16x128xf32>
    %28 = vector.extract_strided_slice %4 {offsets = [1, 0], sizes = [1, 128], strides = [1, 1]} : vector<3x128xf32> to vector<1x128xf32>
    %29 = vector.broadcast %28 : vector<1x128xf32> to vector<16x128xf32>
    %30 = arith.mulf %27, %29 : vector<16x128xf32>
    %31 = vector.extract_strided_slice %4 {offsets = [2, 0], sizes = [1, 128], strides = [1, 1]} : vector<3x128xf32> to vector<1x128xf32>
    %32 = vector.broadcast %31 : vector<1x128xf32> to vector<16x128xf32>
    %33 = arith.addf %30, %32 : vector<16x128xf32>
    %cst_12 = arith.constant 0.000000e+00 : f32
    %34 = vector.broadcast %cst_12 : f32 to vector<16x128xf32>
    %35 = arith.cmpf oge, %33, %34 : vector<16x128xf32>
    %cst_13 = arith.constant 0.00999999977 : f32
    %36 = vector.broadcast %cst_13 : f32 to vector<16x128xf32>
    %37 = arith.mulf %36, %33 : vector<16x128xf32>
    %38 = arith.select %35, %33, %37 : vector<16x128xi1>, vector<16x128xf32>
    %39 = arith.truncf %38 : vector<16x128xf32> to vector<16x128xbf16>
    %c0_14 = arith.constant 0 : index
    %c0_15 = arith.constant 0 : index
    %40 = vector.load %arg3[%c0_14, %c0_15] : memref<128x128xbf16, #tpu.memory_space<vmem>>, vector<128x128xbf16>
    %cst_16 = arith.constant dense<0.000000e+00> : vector<16x128xf32>
    %41 = tpu.matmul %39, %40, %cst_16 {dimension_numbers = #tpu.dot_dimension_numbers<[1], [0], [0], [1], [0, 0, 1, 1], [], []>} : vector<16x128xbf16>, vector<128x128xbf16>, vector<16x128xf32> -> vector<16x128xf32>
    %c1 = arith.constant 1 : index
    %c0_17 = arith.constant 0 : index
    %c0_18 = arith.constant 0 : index
    %42 = vector.load %arg5[%c1, %c0_17, %c0_18] : memref<3x3x128xf32, #tpu.memory_space<vmem>>, vector<1x3x128xf32>
    %43 = vector.shape_cast %42 : vector<1x3x128xf32> to vector<3x128xf32>
    %44 = vector.extract_strided_slice %43 {offsets = [0, 0], sizes = [1, 128], strides = [1, 1]} : vector<3x128xf32> to vector<1x128xf32>
    %45 = vector.broadcast %44 : vector<1x128xf32> to vector<16x128xf32>
    %46 = arith.addf %41, %45 : vector<16x128xf32>
    %cst_19 = arith.constant dense<0.000000e+00> : vector<16xf32>
    %47 = vector.multi_reduction <add>, %46, %cst_19 [1] : vector<16x128xf32> to vector<16xf32>
    %48 = vector.shape_cast %47 : vector<16xf32> to vector<16x1xf32>
    %cst_20 = arith.constant 3.125000e-02 : f32
    %49 = vector.broadcast %cst_20 : f32 to vector<16x1xf32>
    %50 = arith.mulf %48, %49 : vector<16x1xf32>
    %51 = arith.mulf %46, %46 : vector<16x128xf32>
    %cst_21 = arith.constant dense<0.000000e+00> : vector<16xf32>
    %52 = vector.multi_reduction <add>, %51, %cst_21 [1] : vector<16x128xf32> to vector<16xf32>
    %53 = vector.shape_cast %52 : vector<16xf32> to vector<16x1xf32>
    %cst_22 = arith.constant 3.125000e-02 : f32
    %54 = vector.broadcast %cst_22 : f32 to vector<16x1xf32>
    %55 = arith.mulf %53, %54 : vector<16x1xf32>
    %56 = arith.mulf %50, %50 : vector<16x1xf32>
    %57 = arith.subf %55, %56 : vector<16x1xf32>
    %cst_23 = arith.constant 0.000000e+00 : f32
    %58 = vector.broadcast %cst_23 : f32 to vector<16x1xf32>
    %59 = arith.maximumf %57, %58 : vector<16x1xf32>
    %60 = vector.broadcast %50 : vector<16x1xf32> to vector<16x128xf32>
    %61 = arith.subf %46, %60 : vector<16x128xf32>
    %cst_24 = arith.constant 9.99999974E-6 : f32
    %62 = vector.broadcast %cst_24 : f32 to vector<16x1xf32>
    %63 = arith.addf %59, %62 : vector<16x1xf32>
    %64 = math.rsqrt %63 : vector<16x1xf32>
    %65 = vector.broadcast %64 : vector<16x1xf32> to vector<16x128xf32>
    %66 = arith.mulf %61, %65 : vector<16x128xf32>
    %67 = vector.extract_strided_slice %43 {offsets = [1, 0], sizes = [1, 128], strides = [1, 1]} : vector<3x128xf32> to vector<1x128xf32>
    %68 = vector.broadcast %67 : vector<1x128xf32> to vector<16x128xf32>
    %69 = arith.mulf %66, %68 : vector<16x128xf32>
    %70 = vector.extract_strided_slice %43 {offsets = [2, 0], sizes = [1, 128], strides = [1, 1]} : vector<3x128xf32> to vector<1x128xf32>
    %71 = vector.broadcast %70 : vector<1x128xf32> to vector<16x128xf32>
    %72 = arith.addf %69, %71 : vector<16x128xf32>
    %cst_25 = arith.constant 0.000000e+00 : f32
    %73 = vector.broadcast %cst_25 : f32 to vector<16x128xf32>
    %74 = arith.cmpf oge, %72, %73 : vector<16x128xf32>
    %cst_26 = arith.constant 0.00999999977 : f32
    %75 = vector.broadcast %cst_26 : f32 to vector<16x128xf32>
    %76 = arith.mulf %75, %72 : vector<16x128xf32>
    %77 = arith.select %74, %72, %76 : vector<16x128xi1>, vector<16x128xf32>
    %78 = arith.truncf %77 : vector<16x128xf32> to vector<16x128xbf16>
    %c0_27 = arith.constant 0 : index
    %c0_28 = arith.constant 0 : index
    %79 = vector.load %arg4[%c0_27, %c0_28] : memref<128x128xbf16, #tpu.memory_space<vmem>>, vector<128x128xbf16>
    %cst_29 = arith.constant dense<0.000000e+00> : vector<16x128xf32>
    %80 = tpu.matmul %78, %79, %cst_29 {dimension_numbers = #tpu.dot_dimension_numbers<[1], [0], [0], [1], [0, 0, 1, 1], [], []>} : vector<16x128xbf16>, vector<128x128xbf16>, vector<16x128xf32> -> vector<16x128xf32>
    %c2 = arith.constant 2 : index
    %c0_30 = arith.constant 0 : index
    %c0_31 = arith.constant 0 : index
    %81 = vector.load %arg5[%c2, %c0_30, %c0_31] : memref<3x3x128xf32, #tpu.memory_space<vmem>>, vector<1x3x128xf32>
    %82 = vector.shape_cast %81 : vector<1x3x128xf32> to vector<3x128xf32>
    %83 = vector.extract_strided_slice %82 {offsets = [0, 0], sizes = [1, 128], strides = [1, 1]} : vector<3x128xf32> to vector<1x128xf32>
    %84 = vector.broadcast %83 : vector<1x128xf32> to vector<16x128xf32>
    %85 = arith.addf %80, %84 : vector<16x128xf32>
    %cst_32 = arith.constant dense<0.000000e+00> : vector<16xf32>
    %86 = vector.multi_reduction <add>, %85, %cst_32 [1] : vector<16x128xf32> to vector<16xf32>
    %87 = vector.shape_cast %86 : vector<16xf32> to vector<16x1xf32>
    %cst_33 = arith.constant 3.125000e-02 : f32
    %88 = vector.broadcast %cst_33 : f32 to vector<16x1xf32>
    %89 = arith.mulf %87, %88 : vector<16x1xf32>
    %90 = arith.mulf %85, %85 : vector<16x128xf32>
    %cst_34 = arith.constant dense<0.000000e+00> : vector<16xf32>
    %91 = vector.multi_reduction <add>, %90, %cst_34 [1] : vector<16x128xf32> to vector<16xf32>
    %92 = vector.shape_cast %91 : vector<16xf32> to vector<16x1xf32>
    %cst_35 = arith.constant 3.125000e-02 : f32
    %93 = vector.broadcast %cst_35 : f32 to vector<16x1xf32>
    %94 = arith.mulf %92, %93 : vector<16x1xf32>
    %95 = arith.mulf %89, %89 : vector<16x1xf32>
    %96 = arith.subf %94, %95 : vector<16x1xf32>
    %cst_36 = arith.constant 0.000000e+00 : f32
    %97 = vector.broadcast %cst_36 : f32 to vector<16x1xf32>
    %98 = arith.maximumf %96, %97 : vector<16x1xf32>
    %99 = vector.broadcast %89 : vector<16x1xf32> to vector<16x128xf32>
    %100 = arith.subf %85, %99 : vector<16x128xf32>
    %cst_37 = arith.constant 9.99999974E-6 : f32
    %101 = vector.broadcast %cst_37 : f32 to vector<16x1xf32>
    %102 = arith.addf %98, %101 : vector<16x1xf32>
    %103 = math.rsqrt %102 : vector<16x1xf32>
    %104 = vector.broadcast %103 : vector<16x1xf32> to vector<16x128xf32>
    %105 = arith.mulf %100, %104 : vector<16x128xf32>
    %106 = vector.extract_strided_slice %82 {offsets = [1, 0], sizes = [1, 128], strides = [1, 1]} : vector<3x128xf32> to vector<1x128xf32>
    %107 = vector.broadcast %106 : vector<1x128xf32> to vector<16x128xf32>
    %108 = arith.mulf %105, %107 : vector<16x128xf32>
    %109 = vector.extract_strided_slice %82 {offsets = [2, 0], sizes = [1, 128], strides = [1, 1]} : vector<3x128xf32> to vector<1x128xf32>
    %110 = vector.broadcast %109 : vector<1x128xf32> to vector<16x128xf32>
    %111 = arith.addf %108, %110 : vector<16x128xf32>
    %cst_38 = arith.constant 0.000000e+00 : f32
    %112 = vector.broadcast %cst_38 : f32 to vector<16x128xf32>
    %113 = arith.cmpf oge, %111, %112 : vector<16x128xf32>
    %cst_39 = arith.constant 0.00999999977 : f32
    %114 = vector.broadcast %cst_39 : f32 to vector<16x128xf32>
    %115 = arith.mulf %114, %111 : vector<16x128xf32>
    %116 = arith.select %113, %111, %115 : vector<16x128xi1>, vector<16x128xf32>
    %117 = arith.truncf %116 : vector<16x128xf32> to vector<16x128xbf16>
    %c0_40 = arith.constant 0 : index
    %c0_41 = arith.constant 0 : index
    %118 = vector.load %arg6[%c0_40, %c0_41] : memref<128x128xbf16, #tpu.memory_space<vmem>>, vector<128x128xbf16>
    %cst_42 = arith.constant dense<0.000000e+00> : vector<16x128xf32>
    %119 = tpu.matmul %117, %118, %cst_42 {dimension_numbers = #tpu.dot_dimension_numbers<[1], [0], [0], [1], [0, 0, 1, 1], [], []>} : vector<16x128xbf16>, vector<128x128xbf16>, vector<16x128xf32> -> vector<16x128xf32>
    %c0_43 = arith.constant 0 : index
    %c0_44 = arith.constant 0 : index
    %120 = vector.load %arg7[%c0_43, %c0_44] : memref<1x128xf32, #tpu.memory_space<vmem>>, vector<1x128xf32>
    %121 = vector.broadcast %120 : vector<1x128xf32> to vector<16x128xf32>
    %122 = arith.addf %119, %121 : vector<16x128xf32>
    %c0_45 = arith.constant 0 : index
    %c0_46 = arith.constant 0 : index
    %123 = vector.load %arg8[%c0_45, %c0_46] : memref<16x128xf32, #tpu.memory_space<vmem>>, vector<16x128xf32>
    tpu.vector_store %arg8[%c0_45, %c0_46], %122 {strides = array<i32>} : memref<16x128xf32, #tpu.memory_space<vmem>>, vector<16x128xf32>,
    return
  }
  func.func @transform_0(%arg0: i32) -> (i32, i32) {
    %c0_i32 = arith.constant 0 : i32
    %c0_i32_0 = arith.constant 0 : i32
    return %arg0, %c0_i32 : i32, i32
  }
  func.func @transform_1(%arg0: i32) -> (i32, i32) {
    %c0_i32 = arith.constant 0 : i32
    %c0_i32_0 = arith.constant 0 : i32
    %c0_i32_1 = arith.constant 0 : i32
    return %c0_i32, %c0_i32_0 : i32, i32
  }
  func.func @transform_2(%arg0: i32) -> (i32, i32) {
    %c0_i32 = arith.constant 0 : i32
    %c0_i32_0 = arith.constant 0 : i32
    %c0_i32_1 = arith.constant 0 : i32
    return %c0_i32, %c0_i32_0 : i32, i32
  }
  func.func @transform_3(%arg0: i32) -> (i32, i32) {
    %c0_i32 = arith.constant 0 : i32
    %c0_i32_0 = arith.constant 0 : i32
    %c0_i32_1 = arith.constant 0 : i32
    return %c0_i32, %c0_i32_0 : i32, i32
  }
  func.func @transform_4(%arg0: i32) -> (i32, i32, i32) {
    %c0_i32 = arith.constant 0 : i32
    %c0_i32_0 = arith.constant 0 : i32
    %c0_i32_1 = arith.constant 0 : i32
    %c0_i32_2 = arith.constant 0 : i32
    return %c0_i32, %c0_i32_0, %c0_i32_1 : i32, i32, i32
  }
  func.func @transform_5(%arg0: i32) -> (i32, i32) {
    %c0_i32 = arith.constant 0 : i32
    %c0_i32_0 = arith.constant 0 : i32
    %c0_i32_1 = arith.constant 0 : i32
    return %c0_i32, %c0_i32_0 : i32, i32
  }
  func.func @transform_6(%arg0: i32) -> (i32, i32) {
    %c0_i32 = arith.constant 0 : i32
    %c0_i32_0 = arith.constant 0 : i32
    %c0_i32_1 = arith.constant 0 : i32
    return %c0_i32, %c0_i32_0 : i32, i32
  }
  func.func @transform_7(%arg0: i32) -> (i32, i32) {
    %c0_i32 = arith.constant 0 : i32
    %c0_i32_0 = arith.constant 0 : i32
    return %arg0, %c0_i32 : i32, i32
  }
}

module attributes {stable_mosaic.version = 11 : i64} {
  func.func @kernel(%arg0: i32, %arg1: memref<16x16xbf16, #tpu.memory_space<vmem>>, %arg2: memref<16x128xbf16, #tpu.memory_space<vmem>>, %arg3: memref<128x128xbf16, #tpu.memory_space<vmem>>, %arg4: memref<128x128xbf16, #tpu.memory_space<vmem>>, %arg5: memref<3x3x128xf32, #tpu.memory_space<vmem>>, %arg6: memref<128x128xbf16, #tpu.memory_space<vmem>>, %arg7: memref<1x128xf32, #tpu.memory_space<vmem>>, %arg8: memref<16x128xf32, #tpu.memory_space<vmem>>) attributes {dimension_semantics = [#tpu.dimension_semantics<parallel>], iteration_bounds = array<i64: 1>, scalar_prefetch = 0 : i64, scratch_operands = 0 : i64, tpu.core_type = #tpu.core_type<tc>, window_params = [{transform_indices = @transform_0, window_bounds = array<i64: 16, 16>}, {pipeline_mode = #tpu.pipeline_mode<synchronous>, transform_indices = @transform_1, window_bounds = array<i64: 16, 128>}, {pipeline_mode = #tpu.pipeline_mode<synchronous>, transform_indices = @transform_2, window_bounds = array<i64: 128, 128>}, {pipeline_mode = #tpu.pipeline_mode<synchronous>, transform_indices = @transform_3, window_bounds = array<i64: 128, 128>}, {pipeline_mode = #tpu.pipeline_mode<synchronous>, transform_indices = @transform_4, window_bounds = array<i64: 3, 3, 128>}, {pipeline_mode = #tpu.pipeline_mode<synchronous>, transform_indices = @transform_5, window_bounds = array<i64: 128, 128>}, {pipeline_mode = #tpu.pipeline_mode<synchronous>, transform_indices = @transform_6, window_bounds = array<i64: 1, 128>}, {transform_indices = @transform_7, window_bounds = array<i64: 16, 128>}]} {
    %c0 = arith.constant 0 : index
    %c0_0 = arith.constant 0 : index
    %0 = vector.load %arg1[%c0, %c0_0] : memref<16x16xbf16, #tpu.memory_space<vmem>>, vector<16x16xbf16>
    %c0_1 = arith.constant 0 : index
    %c0_2 = arith.constant 0 : index
    %1 = vector.load %arg2[%c0_1, %c0_2] : memref<16x128xbf16, #tpu.memory_space<vmem>>, vector<16x128xbf16>
    %cst = arith.constant dense<0.000000e+00> : vector<16x128xf32>
    %2 = tpu.matmul %0, %1, %cst {dimension_numbers = #tpu.dot_dimension_numbers<[1], [0], [0], [1], [0, 0, 1, 1], [], []>} : vector<16x16xbf16>, vector<16x128xbf16>, vector<16x128xf32> -> vector<16x128xf32>
    %c0_3 = arith.constant 0 : index
    %c0_4 = arith.constant 0 : index
    %c0_5 = arith.constant 0 : index
    %3 = vector.load %arg5[%c0_3, %c0_4, %c0_5] : memref<3x3x128xf32, #tpu.memory_space<vmem>>, vector<1x3x128xf32>
    %4 = vector.shape_cast %3 : vector<1x3x128xf32> to vector<3x128xf32>
    %5 = vector.extract_strided_slice %4 {offsets = [0, 0], sizes = [1, 128], strides = [1, 1]} : vector<3x128xf32> to vector<1x128xf32>
    %6 = vector.broadcast %5 : vector<1x128xf32> to vector<16x128xf32>
    %7 = arith.addf %2, %6 : vector<16x128xf32>
    %cst_6 = arith.constant dense<0.000000e+00> : vector<16xf32>
    %8 = vector.multi_reduction <add>, %7, %cst_6 [1] : vector<16x128xf32> to vector<16xf32>
    %9 = vector.shape_cast %8 : vector<16xf32> to vector<16x1xf32>
    %cst_7 = arith.constant 3.125000e-02 : f32
    %10 = vector.broadcast %cst_7 : f32 to vector<16x1xf32>
    %11 = arith.mulf %9, %10 : vector<16x1xf32>
    %12 = arith.mulf %7, %7 : vector<16x128xf32>
    %cst_8 = arith.constant dense<0.000000e+00> : vector<16xf32>
    %13 = vector.multi_reduction <add>, %12, %cst_8 [1] : vector<16x128xf32> to vector<16xf32>
    %14 = vector.shape_cast %13 : vector<16xf32> to vector<16x1xf32>
    %cst_9 = arith.constant 3.125000e-02 : f32
    %15 = vector.broadcast %cst_9 : f32 to vector<16x1xf32>
    %16 = arith.mulf %14, %15 : vector<16x1xf32>
    %17 = arith.mulf %11, %11 : vector<16x1xf32>
    %18 = arith.subf %16, %17 : vector<16x1xf32>
    %cst_10 = arith.constant 0.000000e+00 : f32
    %19 = vector.broadcast %cst_10 : f32 to vector<16x1xf32>
    %20 = arith.maximumf %18, %19 : vector<16x1xf32>
    %21 = vector.broadcast %11 : vector<16x1xf32> to vector<16x128xf32>
    %22 = arith.subf %7, %21 : vector<16x128xf32>
    %cst_11 = arith.constant 9.99999974E-6 : f32
    %23 = vector.broadcast %cst_11 : f32 to vector<16x1xf32>
    %24 = arith.addf %20, %23 : vector<16x1xf32>
    %25 = math.rsqrt %24 : vector<16x1xf32>
    %26 = vector.broadcast %25 : vector<16x1xf32> to vector<16x128xf32>
    %27 = arith.mulf %22, %26 : vector<16x128xf32>
    %28 = vector.extract_strided_slice %4 {offsets = [1, 0], sizes = [1, 128], strides = [1, 1]} : vector<3x128xf32> to vector<1x128xf32>
    %29 = vector.broadcast %28 : vector<1x128xf32> to vector<16x128xf32>
    %30 = arith.mulf %27, %29 : vector<16x128xf32>
    %31 = vector.extract_strided_slice %4 {offsets = [2, 0], sizes = [1, 128], strides = [1, 1]} : vector<3x128xf32> to vector<1x128xf32>
    %32 = vector.broadcast %31 : vector<1x128xf32> to vector<16x128xf32>
    %33 = arith.addf %30, %32 : vector<16x128xf32>
    %cst_12 = arith.constant 0.000000e+00 : f32
    %34 = vector.broadcast %cst_12 : f32 to vector<16x128xf32>
    %35 = arith.cmpf oge, %33, %34 : vector<16x128xf32>
    %cst_13 = arith.constant 0.00999999977 : f32
    %36 = vector.broadcast %cst_13 : f32 to vector<16x128xf32>
    %37 = arith.mulf %36, %33 : vector<16x128xf32>
    %38 = arith.select %35, %33, %37 : vector<16x128xi1>, vector<16x128xf32>
    %39 = arith.truncf %38 : vector<16x128xf32> to vector<16x128xbf16>
    %c0_14 = arith.constant 0 : index
    %c0_15 = arith.constant 0 : index
    %40 = vector.load %arg3[%c0_14, %c0_15] : memref<128x128xbf16, #tpu.memory_space<vmem>>, vector<128x128xbf16>
    %cst_16 = arith.constant dense<0.000000e+00> : vector<16x128xf32>
    %41 = tpu.matmul %39, %40, %cst_16 {dimension_numbers = #tpu.dot_dimension_numbers<[1], [0], [0], [1], [0, 0, 1, 1], [], []>} : vector<16x128xbf16>, vector<128x128xbf16>, vector<16x128xf32> -> vector<16x128xf32>
    %c1 = arith.constant 1 : index
    %c0_17 = arith.constant 0 : index
    %c0_18 = arith.constant 0 : index
    %42 = vector.load %arg5[%c1, %c0_17, %c0_18] : memref<3x3x128xf32, #tpu.memory_space<vmem>>, vector<1x3x128xf32>
    %43 = vector.shape_cast %42 : vector<1x3x128xf32> to vector<3x128xf32>
    %44 = vector.extract_strided_slice %43 {offsets = [0, 0], sizes = [1, 128], strides = [1, 1]} : vector<3x128xf32> to vector<1x128xf32>
    %45 = vector.broadcast %44 : vector<1x128xf32> to vector<16x128xf32>
    %46 = arith.addf %41, %45 : vector<16x128xf32>
    %cst_19 = arith.constant dense<0.000000e+00> : vector<16xf32>
    %47 = vector.multi_reduction <add>, %46, %cst_19 [1] : vector<16x128xf32> to vector<16xf32>
    %48 = vector.shape_cast %47 : vector<16xf32> to vector<16x1xf32>
    %cst_20 = arith.constant 3.125000e-02 : f32
    %49 = vector.broadcast %cst_20 : f32 to vector<16x1xf32>
    %50 = arith.mulf %48, %49 : vector<16x1xf32>
    %51 = arith.mulf %46, %46 : vector<16x128xf32>
    %cst_21 = arith.constant dense<0.000000e+00> : vector<16xf32>
    %52 = vector.multi_reduction <add>, %51, %cst_21 [1] : vector<16x128xf32> to vector<16xf32>
    %53 = vector.shape_cast %52 : vector<16xf32> to vector<16x1xf32>
    %cst_22 = arith.constant 3.125000e-02 : f32
    %54 = vector.broadcast %cst_22 : f32 to vector<16x1xf32>
    %55 = arith.mulf %53, %54 : vector<16x1xf32>
    %56 = arith.mulf %50, %50 : vector<16x1xf32>
    %57 = arith.subf %55, %56 : vector<16x1xf32>
    %cst_23 = arith.constant 0.000000e+00 : f32
    %58 = vector.broadcast %cst_23 : f32 to vector<16x1xf32>
    %59 = arith.maximumf %57, %58 : vector<16x1xf32>
    %60 = vector.broadcast %50 : vector<16x1xf32> to vector<16x128xf32>
    %61 = arith.subf %46, %60 : vector<16x128xf32>
    %cst_24 = arith.constant 9.99999974E-6 : f32
    %62 = vector.broadcast %cst_24 : f32 to vector<16x1xf32>
    %63 = arith.addf %59, %62 : vector<16x1xf32>
    %64 = math.rsqrt %63 : vector<16x1xf32>
    %65 = vector.broadcast %64 : vector<16x1xf32> to vector<16x128xf32>
    %66 = arith.mulf %61, %65 : vector<16x128xf32>
    %67 = vector.extract_strided_slice %43 {offsets = [1, 0], sizes = [1, 128], strides = [1, 1]} : vector<3x128xf32> to vector<1x128xf32>
    %68 = vector.broadcast %67 : vector<1x128xf32> to vector<16x128xf32>
    %69 = arith.mulf %66, %68 : vector<16x128xf32>
    %70 = vector.extract_strided_slice %43 {offsets = [2, 0], sizes = [1, 128], strides = [1, 1]} : vector<3x128xf32> to vector<1x128xf32>
    %71 = vector.broadcast %70 : vector<1x128xf32> to vector<16x128xf32>
    %72 = arith.addf %69, %71 : vector<16x128xf32>
    %cst_25 = arith.constant 0.000000e+00 : f32
    %73 = vector.broadcast %cst_25 : f32 to vector<16x128xf32>
    %74 = arith.cmpf oge, %72, %73 : vector<16x128xf32>
    %cst_26 = arith.constant 0.00999999977 : f32
    %75 = vector.broadcast %cst_26 : f32 to vector<16x128xf32>
    %76 = arith.mulf %75, %72 : vector<16x128xf32>
    %77 = arith.select %74, %72, %76 : vector<16x128xi1>, vector<16x128xf32>
    %78 = arith.truncf %77 : vector<16x128xf32> to vector<16x128xbf16>
    %c0_27 = arith.constant 0 : index
    %c0_28 = arith.constant 0 : index
    %79 = vector.load %arg4[%c0_27, %c0_28] : memref<128x128xbf16, #tpu.memory_space<vmem>>, vector<128x128xbf16>
    %cst_29 = arith.constant dense<0.000000e+00> : vector<16x128xf32>
    %80 = tpu.matmul %78, %79, %cst_29 {dimension_numbers = #tpu.dot_dimension_numbers<[1], [0], [0], [1], [0, 0, 1, 1], [], []>} : vector<16x128xbf16>, vector<128x128xbf16>, vector<16x128xf32> -> vector<16x128xf32>
    %c2 = arith.constant 2 : index
    %c0_30 = arith.constant 0 : index
    %c0_31 = arith.constant 0 : index
    %81 = vector.load %arg5[%c2, %c0_30, %c0_31] : memref<3x3x128xf32, #tpu.memory_space<vmem>>, vector<1x3x128xf32>
    %82 = vector.shape_cast %81 : vector<1x3x128xf32> to vector<3x128xf32>
    %83 = vector.extract_strided_slice %82 {offsets = [0, 0], sizes = [1, 128], strides = [1, 1]} : vector<3x128xf32> to vector<1x128xf32>
    %84 = vector.broadcast %83 : vector<1x128xf32> to vector<16x128xf32>
    %85 = arith.addf %80, %84 : vector<16x128xf32>
    %cst_32 = arith.constant dense<0.000000e+00> : vector<16xf32>
    %86 = vector.multi_reduction <add>, %85, %cst_32 [1] : vector<16x128xf32> to vector<16xf32>
    %87 = vector.shape_cast %86 : vector<16xf32> to vector<16x1xf32>
    %cst_33 = arith.constant 3.125000e-02 : f32
    %88 = vector.broadcast %cst_33 : f32 to vector<16x1xf32>
    %89 = arith.mulf %87, %88 : vector<16x1xf32>
    %90 = arith.mulf %85, %85 : vector<16x128xf32>
    %cst_34 = arith.constant dense<0.000000e+00> : vector<16xf32>
    %91 = vector.multi_reduction <add>, %90, %cst_34 [1] : vector<16x128xf32> to vector<16xf32>
    %92 = vector.shape_cast %91 : vector<16xf32> to vector<16x1xf32>
    %cst_35 = arith.constant 3.125000e-02 : f32
    %93 = vector.broadcast %cst_35 : f32 to vector<16x1xf32>
    %94 = arith.mulf %92, %93 : vector<16x1xf32>
    %95 = arith.mulf %89, %89 : vector<16x1xf32>
    %96 = arith.subf %94, %95 : vector<16x1xf32>
    %cst_36 = arith.constant 0.000000e+00 : f32
    %97 = vector.broadcast %cst_36 : f32 to vector<16x1xf32>
    %98 = arith.maximumf %96, %97 : vector<16x1xf32>
    %99 = vector.broadcast %89 : vector<16x1xf32> to vector<16x128xf32>
    %100 = arith.subf %85, %99 : vector<16x128xf32>
    %cst_37 = arith.constant 9.99999974E-6 : f32
    %101 = vector.broadcast %cst_37 : f32 to vector<16x1xf32>
    %102 = arith.addf %98, %101 : vector<16x1xf32>
    %103 = math.rsqrt %102 : vector<16x1xf32>
    %104 = vector.broadcast %103 : vector<16x1xf32> to vector<16x128xf32>
    %105 = arith.mulf %100, %104 : vector<16x128xf32>
    %106 = vector.extract_strided_slice %82 {offsets = [1, 0], sizes = [1, 128], strides = [1, 1]} : vector<3x128xf32> to vector<1x128xf32>
    %107 = vector.broadcast %106 : vector<1x128xf32> to vector<16x128xf32>
    %108 = arith.mulf %105, %107 : vector<16x128xf32>
    %109 = vector.extract_strided_slice %82 {offsets = [2, 0], sizes = [1, 128], strides = [1, 1]} : vector<3x128xf32> to vector<1x128xf32>
    %110 = vector.broadcast %109 : vector<1x128xf32> to vector<16x128xf32>
    %111 = arith.addf %108, %110 : vector<16x128xf32>
    %cst_38 = arith.constant 0.000000e+00 : f32
    %112 = vector.broadcast %cst_38 : f32 to vector<16x128xf32>
    %113 = arith.cmpf oge, %111, %112 : vector<16x128xf32>
    %cst_39 = arith.constant 0.00999999977 : f32
    %114 = vector.broadcast %cst_39 : f32 to vector<16x128xf32>
    %115 = arith.mulf %114, %111 : vector<16x128xf32>
    %116 = arith.select %113, %111, %115 : vector<16x128xi1>, vector<16x128xf32>
    %117 = arith.truncf %116 : vector<16x128xf32> to vector<16x128xbf16>
    %c0_40 = arith.constant 0 : index
    %c0_41 = arith.constant 0 : index
    %118 = vector.load %arg6[%c0_40, %c0_41] : memref<128x128xbf16, #tpu.memory_space<vmem>>, vector<128x128xbf16>
    %cst_42 = arith.constant dense<0.000000e+00> : vector<16x128xf32>
    %119 = tpu.matmul %117, %118, %cst_42 {dimension_numbers = #tpu.dot_dimension_numbers<[1], [0], [0], [1], [0, 0, 1, 1], [], []>} : vector<16x128xbf16>, vector<128x128xbf16>, vector<16x128xf32> -> vector<16x128xf32>
    %c0_43 = arith.constant 0 : index
    %c0_44 = arith.constant 0 : index
    %120 = vector.load %arg7[%c0_43, %c0_44] : memref<1x128xf32, #tpu.memory_space<vmem>>, vector<1x128xf32>
    %121 = vector.broadcast %120 : vector<1x128xf32> to vector<16x128xf32>
    %122 = arith.addf %119, %121 : vector<16x128xf32>
    %c0_45 = arith.constant 0 : index
    %c0_46 = arith.constant 0 : index
    %123 = vector.load %arg8[%c0_45, %c0_46] : memref<16x128xf32, #tpu.memory_space<vmem>>, vector<16x128xf32>
    tpu.vector_store %arg8[%c0_45, %c0_46], %122 {strides = array<i32>} : memref<16x128xf32, #tpu.memory_space<vmem>>, vector<16x128xf32>,
    return
  }
  func.func @transform_0(%arg0: i32) -> (i32, i32) {
    %c0_i32 = arith.constant 0 : i32
    %c0_i32_0 = arith.constant 0 : i32
    return %arg0, %c0_i32 : i32, i32
  }
  func.func @transform_1(%arg0: i32) -> (i32, i32) {
    %c0_i32 = arith.constant 0 : i32
    %c0_i32_0 = arith.constant 0 : i32
    %c0_i32_1 = arith.constant 0 : i32
    return %c0_i32, %c0_i32_0 : i32, i32
  }
  func.func @transform_2(%arg0: i32) -> (i32, i32) {
    %c0_i32 = arith.constant 0 : i32
    %c0_i32_0 = arith.constant 0 : i32
    %c0_i32_1 = arith.constant 0 : i32
    return %c0_i32, %c0_i32_0 : i32, i32
  }
  func.func @transform_3(%arg0: i32) -> (i32, i32) {
    %c0_i32 = arith.constant 0 : i32
    %c0_i32_0 = arith.constant 0 : i32
    %c0_i32_1 = arith.constant 0 : i32
    return %c0_i32, %c0_i32_0 : i32, i32
  }
  func.func @transform_4(%arg0: i32) -> (i32, i32, i32) {
    %c0_i32 = arith.constant 0 : i32
    %c0_i32_0 = arith.constant 0 : i32
    %c0_i32_1 = arith.constant 0 : i32
    %c0_i32_2 = arith.constant 0 : i32
    return %c0_i32, %c0_i32_0, %c0_i32_1 : i32, i32, i32
  }
  func.func @transform_5(%arg0: i32) -> (i32, i32) {
    %c0_i32 = arith.constant 0 : i32
    %c0_i32_0 = arith.constant 0 : i32
    %c0_i32_1 = arith.constant 0 : i32
    return %c0_i32, %c0_i32_0 : i32, i32
  }
  func.func @transform_6(%arg0: i32) -> (i32, i32) {
    %c0_i32 = arith.constant 0 : i32
    %c0_i32_0 = arith.constant 0 : i32
    %c0_i32_1 = arith.constant 0 : i32
    return %c0_i32, %c0_i32_0 : i32, i32
  }
  func.func @transform_7(%arg0: i32) -> (i32, i32) {
    %c0_i32 = arith.constant 0 : i32
    %c0_i32_0 = arith.constant 0 : i32
    return %arg0, %c0_i32 : i32, i32
  }
}

</mosaic_0001>

<bundles_post_ra>
// kernel: tpu_custom_call.1
= control target key start
LH: loop header
LB: loop body
LE: loop exit
PB: predicated region body
PF: predicated region fallthrough
CT: control target
= control target key end

     0   :  { %12 = vsyncpa [#allocation3], 0  ;;  %s1185_s0 = inlined_call_operand.hbm [shape: bf16[8,16], index: 0, kind: input, shape index: {}]   ;;  %s1186_s1 = inlined_call_operand.hbm [shape: bf16[16,128], index: 1, kind: input, shape index: {}]   ;;  %s1187_s2 = inlined_call_operand.hbm [shape: bf16[128,128], index: 2, kind: input, shape index: {}]   ;;  %s1188_s3 = inlined_call_operand.hbm [shape: bf16[128,128], index: 3, kind: input, shape index: {}]   ;;  %s1189_s4 = inlined_call_operand.vmem [shape: f32[3,3,128], index: 4, kind: input, shape index: {}]   ;;  %s1190_s5 = inlined_call_operand.hbm [shape: bf16[128,128], index: 5, kind: input, shape index: {}]   ;;  %s1191_s6 = inlined_call_operand.vmem [shape: f32[1,128], index: 6, kind: input, shape index: {}]   ;;  %s1192_s7 = inlined_call_operand.hbm [shape: f32[8,128], index: 7, kind: output, shape index: {}]  }
   0x1   :  { %13 = vsyncpa [#allocation6], 0 }
   0x2   :  { %14 = vsyncpa [#allocation9], 0 }
   0x3   :  { %15 = vsyncpa [#allocation4], 0 }
   0x4   :  { %20 = vsyncadd [#allocation3], 64  ;;  %s972_s24 = smov [#allocation5]   ;;  %s973_s26 = smov [#allocation8]  }
   0x5   :  { %s33_s25 = sshll.u32 %s972_s24, 4  ;;  %s57_s27 = sshll.u32 %s973_s26, 4  ;;  %s34_s25 = int_to_ptr.vmem [resolvable:$true] %s33_s25  ;;  %s1024_s27 = int_to_ptr.vmem [resolvable:$true] %s57_s27 }
   0x6   :  { %s832_s30 = scalar_lea.hbm %s1186_s1, 128 }
   0x7   :  { %p833_p0 = scmp.ne.s32.totalorder %s1186_s1, %s832_s30  ;;  %p836_p1 = scmp.lt.u32.totalorder %s832_s30, %s1186_s1 }
   0x9   :  { %p838_p2 = pnand %p836_p1, %p833_p0 }
   0xb   :  { %841 = shalt.err (!%p838_p2)
}
   0xc   :  { %s842_s12 = scalar_lea.vmem %s34_s25, 128  ;;  %p847_p4 = scmp.lt.s32.totalorder %s34_s25, %s34_s25 }
   0xd   :  { %p843_p3 = scmp.ne.s32.totalorder %s34_s25, %s842_s12  ;;  %p848_p5 = scmp.lt.s32.totalorder %s842_s12, %s842_s12 }
   0xf   :  { %p849_p6 = por %p848_p5, %p847_p4 }
  0x11   :  { %p850_p7 = pnand %p849_p6, %p843_p3 }
  0x13   :  { %853 = shalt.err (!%p850_p7)
}
  0x14   :  { %s974_s13 = smov 64   ;;  %s975_s14 = smov 4  }
  0x15   :  { %39 = dma.hbm_to_vmem [thread:$0]  %s1186_s1, 128, %s34_s25, [#allocation6], %s974_s13, %s974_s13, %s975_s14  }
  0x16   :  { %s854_s19 = scalar_lea.hbm %s1188_s3, 1024 }
  0x17   :  { %p855_p8 = scmp.ne.s32.totalorder %s1188_s3, %s854_s19  ;;  %p858_p9 = scmp.lt.u32.totalorder %s854_s19, %s1188_s3 }
  0x19   :  { %p860_p10 = pnand %p858_p9, %p855_p8 }
  0x1b   :  { %863 = shalt.err (!%p860_p10)
}
  0x1c   :  { %s864_s24 = scalar_lea.vmem %s1024_s27, 1024  ;;  %p869_p12 = scmp.lt.s32.totalorder %s1024_s27, %s1024_s27 }
  0x1d   :  { %p865_p11 = scmp.ne.s32.totalorder %s1024_s27, %s864_s24  ;;  %p870_p13 = scmp.lt.s32.totalorder %s864_s24, %s864_s24 }
  0x1f   :  { %p871_p0 = por %p870_p13, %p869_p12 }
  0x21   :  { %p872_p1 = pnand %p871_p0, %p865_p11 }
  0x23   :  { %875 = shalt.err (!%p872_p1)
}
  0x24   :  { %63 = dma.hbm_to_vmem [thread:$0]  %s1188_s3, 1024, %s1024_s27, [#allocation9], %s974_s13, %s974_s13, %s975_s14  }
  0x25   :  { %s976_s26 = smov [#allocation2]   ;;  %s977_s29 = smov [#allocation7]  }
  0x26   :  { %s21_s28 = sshll.u32 %s976_s26, 4  ;;  %s45_s30 = sshll.u32 %s977_s29, 4  ;;  %s22_s28 = int_to_ptr.vmem [resolvable:$true] %s21_s28  ;;  %s1061_s30 = int_to_ptr.vmem [resolvable:$true] %s45_s30 }
  0x27   :  { %s876_s10 = scalar_lea.hbm %s1185_s0, 64 }
  0x28   :  { %p877_p2 = scmp.ne.s32.totalorder %s1185_s0, %s876_s10  ;;  %p880_p3 = scmp.lt.u32.totalorder %s876_s10, %s1185_s0 }
  0x2a   :  { %p882_p4 = pnand %p880_p3, %p877_p2 }
  0x2c   :  { %885 = shalt.err (!%p882_p4)
}
  0x2d   :  { %s886_s3 = scalar_lea.vmem %s22_s28, 64  ;;  %s890_s27 = scalar_lea.vmem %s22_s28, 128 }
  0x2e   :  { %p887_p5 = scmp.ne.s32.totalorder %s22_s28, %s886_s3  ;;  %p891_p6 = scmp.lt.s32.totalorder %s22_s28, %s22_s28 }
  0x2f   :  { %p892_p7 = scmp.lt.s32.totalorder %s890_s27, %s886_s3 }
  0x31   :  { %p893_p8 = por %p892_p7, %p891_p6 }
  0x33   :  { %p894_p9 = pnand %p893_p8, %p887_p5 }
  0x35   :  { %897 = shalt.err (!%p894_p9)
}
  0x36   :  { %27 = dma.hbm_to_vmem [thread:$0]  %s1185_s0, 64, %s22_s28, [#allocation3], %s974_s13, %s974_s13, %s975_s14  }
  0x37   :  { %s898_s21 = scalar_lea.hbm %s1187_s2, 1024 }
  0x38   :  { %p899_p10 = scmp.ne.s32.totalorder %s1187_s2, %s898_s21  ;;  %p902_p11 = scmp.lt.u32.totalorder %s898_s21, %s1187_s2 }
  0x3a   :  { %p904_p12 = pnand %p902_p11, %p899_p10 }
  0x3c   :  { %907 = shalt.err (!%p904_p12)
}
  0x3d   :  { %s908_s25 = scalar_lea.vmem %s1061_s30, 1024  ;;  %p913_p0 = scmp.lt.s32.totalorder %s1061_s30, %s1061_s30 }
  0x3e   :  { %p909_p13 = scmp.ne.s32.totalorder %s1061_s30, %s908_s25  ;;  %p914_p1 = scmp.lt.s32.totalorder %s908_s25, %s908_s25 }
  0x40   :  { %p915_p2 = por %p914_p1, %p913_p0 }
  0x42   :  { %p916_p3 = pnand %p915_p2, %p909_p13 }
  0x44   :  { %919 = shalt.err (!%p916_p3)
}
  0x45   :  { %51 = dma.hbm_to_vmem [thread:$0]  %s1187_s2, 1024, %s1061_s30, [#allocation6], %s974_s13, %s974_s13, %s975_s14  }
  0x46   :  { %s978_s28 = smov [#allocation10]   ;;  %s920_s10 = scalar_lea.hbm %s1190_s5, 1024 }
  0x47   :  { %s71_s29 = sshll.u32 %s978_s28, 4  ;;  %p921_p4 = scmp.ne.s32.totalorder %s1190_s5, %s920_s10  ;;  %s72_s29 = int_to_ptr.vmem [resolvable:$true] %s71_s29 }
  0x48   :  { %p924_p5 = scmp.lt.u32.totalorder %s920_s10, %s1190_s5 }
  0x4a   :  { %p926_p6 = pnand %p924_p5, %p921_p4 }
  0x4c   :  { %929 = shalt.err (!%p926_p6)
}
  0x4d   :  { %s930_s3 = scalar_lea.vmem %s72_s29, 1024  ;;  %p935_p8 = scmp.lt.s32.totalorder %s72_s29, %s72_s29 }
  0x4e   :  { %p931_p7 = scmp.ne.s32.totalorder %s72_s29, %s930_s3  ;;  %p936_p9 = scmp.lt.s32.totalorder %s930_s3, %s930_s3 }
  0x50   :  { %p937_p10 = por %p936_p9, %p935_p8 }
  0x52   :  { %p938_p11 = pnand %p937_p10, %p931_p7 }
  0x54   :  { %941 = shalt.err (!%p938_p11)
}
  0x55   :  { %77 = dma.hbm_to_vmem [thread:$0]  %s1190_s5, 1024, %s72_s29, [#allocation9], %s974_s13, %s974_s13, %s975_s14  }
  0x56   :  { %964 = dma.done.wait [#allocation3], 128  }
  0x57   :  { %965 = vsyncadd [#allocation3], 4294967168 }
  0x58   :  { %966 = dma.done.wait [#allocation6], 1152  }
  0x59   :  { %967 = vsyncadd [#allocation6], 4294966144 }
  0x5a   :  { %968 = dma.done.wait [#allocation9], 2048  }
  0x5b   :  { %969 = vsyncadd [#allocation9], 4294965248  ;;  %v979_v0 = vmov 0.0   ;;  %vm980_vm0 = vmmov 0   ;;  %v794_v1 = vld [vmem:[#allocation5] sm:$0xff]   ;;  %v795_v2 = vld [vmem:[#allocation2] sm:$0xff]   ;;  %v101_v3 = vlaneseq }
  0x5c   :  { %716 = vmatprep.subr.bf16.mxu0 %v979_v0  ;;  %718 = vmatprep.mubr.msk.bf16.mxu0 %vm980_vm0, %v979_v0  ;;  %vm116_vm1 = vcmask 130048   ;;  %v100_v6 = vld [vmem:[%s1189_s4] sm:$0x7]  ;;  %v797_v17 = vld [vmem:[#allocation7 + $0x8] sm:$0xff]   ;;  %v798_v18 = vld [vmem:[#allocation7 + $0x10] sm:$0xff]  }
  0x5d   :  { %722 = vmatprep.subr.bf16.mxu1 %v979_v0  ;;  %738 = vmatprep.mubr.msk.bf16.mxu1 %vm980_vm0, %v979_v0  ;;  %v102_v4 = vshrl.u32 %v101_v3, 7  ;;  %v796_v16 = vld [vmem:[#allocation7] sm:$0xff]   ;;  %v799_v19 = vld [vmem:[#allocation7 + $0x18] sm:$0xff]   ;;  %v801_v21 = vld [vmem:[#allocation7 + $0x28] sm:$0xff]  }
  0x5e   :  { %717 = vmatpush3.bf16.msra.mxu0 %v794_v1  ;;  %723 = vmatpush3.bf16.msra.mxu1 %v796_v16  ;;  %v800_v20 = vld [vmem:[#allocation7 + $0x20] sm:$0xff]   ;;  %v802_v22 = vld [vmem:[#allocation7 + $0x30] sm:$0xff]   ;;  %v803_v23 = vld [vmem:[#allocation7 + $0x38] sm:$0xff]  }
  0x5f   :  { %742 = vmatprep.subr.bf16.mxu0 %v979_v0  ;;  %v1122_v5 = vsub.s32 0, %v102_v4  ;;  %724 = vmatprep.subr.bf16.mxu1 %v979_v0  ;;  %v1136_v40 = vsub.s32 1, %v102_v4  ;;  %v1138_v41 = vsub.s32 2, %v102_v4  ;;  %v660_v59 = vld [vmem:[%s1189_s4 + $0x4] sm:$0x7] }
  0x61   :  { %719 = vmatmul.mubr.msk.bf16.vlgmr.msra.gmra.mrb[0].mxu0 %vm116_vm1, %v795_v2  ;;  %v104_v7 = vrot.slane %v100_v6, %v1122_v5  ;;  %v192_v42 = vrot.slane %v100_v6, %v1136_v40  ;;  %v198_v45 = vrot.slane %v100_v6, %v1138_v41  ;;  %v229_v60 = vrot.slane %v660_v59, %v1122_v5 }
  0x62   :  { %758 = vmatprep.mubr.msk.bf16.mxu0 %vm980_vm0, %v979_v0  ;;  %725 = vmatpush3.bf16.msra.mxu1 %v797_v17 }
  0x63   :  { %726 = vmatprep.subr.bf16.mxu1 %v979_v0 }
  0x66   :  { %727 = vmatpush3.bf16.msra.mxu1 %v798_v18 }
  0x67   :  { %728 = vmatprep.subr.bf16.mxu1 %v979_v0 }
  0x6a   :  { %729 = vmatpush3.bf16.msra.mxu1 %v799_v19 }
  0x6b   :  { %730 = vmatprep.subr.bf16.mxu1 %v979_v0 }
  0x6e   :  { %731 = vmatpush3.bf16.msra.mxu1 %v800_v20 }
  0x6f   :  { %732 = vmatprep.subr.bf16.mxu1 %v979_v0 }
  0x72   :  { %733 = vmatpush3.bf16.msra.mxu1 %v801_v21 }
  0x73   :  { %734 = vmatprep.subr.bf16.mxu1 %v979_v0 }
  0x76   :  { %735 = vmatpush3.bf16.msra.mxu1 %v802_v22 }
  0x77   :  { %736 = vmatprep.subr.bf16.mxu1 %v979_v0 }
  0x7a   :  { %737 = vmatpush3.bf16.msra.mxu1 %v803_v23 }
  0x7b   :  { %762 = vmatprep.subr.bf16.mxu1 %v979_v0 }
 0x134   :  { %v154_v8 = vpop.f32.mrb[0].mxu0 }
 0x135   :  { %v155_v9 = vadd.f32 %v154_v8, %v104_v7  ;;  %v720_v10 = vpop.f32.mrb[1].mxu0  ;;  %v805_v8 = vld [vmem:[#allocation8 + $0x8] sm:$0xff]  }
 0x136   :  { %v157_v11 = vpop.f32.mrb[2].mxu0  ;;  %v807_v10 = vld [vmem:[#allocation8 + $0x18] sm:$0xff]  }
 0x137   :  { %v158_v12 = vadd.f32 %v157_v11, %v104_v7  ;;  %161 = vadd.xlane.f32.xlu0 %v155_v9  ;;  %v721_v13 = vpop.f32.mrb[3].mxu0  ;;  %v167_v14 = vmul.f32 %v155_v9, %v155_v9  ;;  %v804_v7 = vld [vmem:[#allocation8] sm:$0xff]  }
 0x138   :  { %743 = vmatpush3.bf16.msra.mxu0 %v804_v7  ;;  %v808_v11 = vld [vmem:[#allocation8 + $0x20] sm:$0xff]   ;;  %v810_v13 = vld [vmem:[#allocation8 + $0x30] sm:$0xff]  }
 0x139   :  { %169 = vadd.xlane.f32.xlu1 %v167_v14  ;;  %v168_v15 = vmul.f32 %v158_v12, %v158_v12  ;;  %744 = vmatprep.subr.bf16.mxu0 %v979_v0  ;;  %v811_v14 = vld [vmem:[#allocation8 + $0x38] sm:$0xff]  }
 0x13b   :  { %163 = vadd.xlane.f32.xlu0 %v158_v12 }
 0x13c   :  { %745 = vmatpush3.bf16.msra.mxu0 %v805_v8 }
 0x13d   :  { %171 = vadd.xlane.f32.xlu1 %v168_v15  ;;  %746 = vmatprep.subr.bf16.mxu0 %v979_v0 }
 0x1c4   :  { %v162_v24 = vpop.xlane.xlu0 %161 }
 0x1c5   :  { %v165_v25 = vmul.f32 0.03125, %v162_v24 }
 0x1c6   :  { %v170_v26 = vpop.xlane.xlu1 %169 }
 0x1c7   :  { %v175_v27 = vmul.f32 %v165_v25, %v165_v25  ;;  %v173_v28 = vmul.f32 0.03125, %v170_v26  ;;  %v181_v43 = vsub.f32 %v155_v9, %v165_v25  ;;  %v806_v9 = vld [vmem:[#allocation8 + $0x10] sm:$0xff]  }
 0x1c8   :  { %v164_v29 = vpop.xlane.xlu0 %163  ;;  %747 = vmatpush3.bf16.msra.mxu0 %v806_v9 }
 0x1c9   :  { %v177_v30 = vsub.f32 %v173_v28, %v175_v27  ;;  %v166_v31 = vmul.f32 0.03125, %v164_v29  ;;  %748 = vmatprep.subr.bf16.mxu0 %v979_v0 }
 0x1ca   :  { %v172_v32 = vpop.xlane.xlu1 %171 }
 0x1cb   :  { %v179_v33 = vmax.f32 %v177_v30, 0.0  ;;  %v176_v34 = vmul.f32 %v166_v31, %v166_v31  ;;  %v174_v35 = vmul.f32 0.03125, %v172_v32  ;;  %v182_v47 = vsub.f32 %v158_v12, %v166_v31  ;;  %v809_v12 = vld [vmem:[#allocation8 + $0x28] sm:$0xff]  }
 0x1cc   :  { %749 = vmatpush3.bf16.msra.mxu0 %v807_v10  ;;  %v350_v31 = vrot.slane %v660_v59, %v1136_v40 }
 0x1cd   :  { %v183_v36 = vadd.f32 1e-05, %v179_v33  ;;  %v178_v37 = vsub.f32 %v174_v35, %v176_v34  ;;  %750 = vmatprep.subr.bf16.mxu0 %v979_v0  ;;  %v356_v34 = vrot.slane %v660_v59, %v1138_v41 }
 0x1cf   :  { %820 = vrsqrt.f32 %v183_v36  ;;  %v180_v38 = vmax.f32 %v178_v37, 0.0 }
 0x1d0   :  { %751 = vmatpush3.bf16.msra.mxu0 %v808_v11 }
 0x1d1   :  { %v184_v39 = vadd.f32 1e-05, %v180_v38  ;;  %752 = vmatprep.subr.bf16.mxu0 %v979_v0 }
 0x1d3   :  { %822 = vrsqrt.f32 %v184_v39 }
 0x1d4   :  { %753 = vmatpush3.bf16.msra.mxu0 %v809_v12 }
 0x1d5   :  { %754 = vmatprep.subr.bf16.mxu0 %v979_v0 }
 0x1d8   :  { %755 = vmatpush3.bf16.msra.mxu0 %v810_v13 }
 0x1d9   :  { %v821_v44 = vpop.eup %820  ;;  %756 = vmatprep.subr.bf16.mxu0 %v979_v0 }
 0x1da   :  { %v187_v46 = vmul.f32 %v821_v44, %v181_v43 }
 0x1dc   :  { %v193_v48 = vmul.f32 %v192_v42, %v187_v46  ;;  %757 = vmatpush3.bf16.msra.mxu0 %v811_v14 }
 0x1dd   :  { %v823_v49 = vpop.eup %822 }
 0x1de   :  { %v188_v50 = vmul.f32 %v823_v49, %v182_v47  ;;  %v199_v51 = vadd.f32 %v198_v45, %v193_v48 }
 0x1e0   :  { %v194_v52 = vmul.f32 %v192_v42, %v188_v50  ;;  %v203_v54 = vmul.f32 0.01, %v199_v51  ;;  %vm201_vm2 = vcmp.ge.f32.partialorder %v199_v51, 0.0  ;;  %v669_v50 = vld [vmem:[%s1189_s4 + $0x8] sm:$0x7] }
 0x1e2   :  { %v200_v53 = vadd.f32 %v198_v45, %v194_v52  ;;  %v205_v56 = vsel %vm201_vm2, %v199_v51, %v203_v54  ;;  %v387_v51 = vrot.slane %v669_v50, %v1122_v5  ;;  %v814_v5 = vld [vmem:[#allocation10 + $0x10] sm:$0xff]  }
 0x1e4   :  { %vm202_vm3 = vcmp.ge.f32.partialorder %v200_v53, 0.0  ;;  %v204_v55 = vmul.f32 0.01, %v200_v53 }
 0x1e6   :  { %v206_v57 = vsel %vm202_vm3, %v200_v53, %v204_v55 }
 0x1e7   :  { %v207_v58 = vpack.c.bf16 %v206_v57, %v205_v56 }
 0x1e9   :  { %739 = vmatmul.mubr.bf16.vlgmr.msra.gmra.mrb[0].mxu1 %v207_v58 }
 0x1ea   :  { %778 = vmatprep.mubr.msk.bf16.mxu1 %vm980_vm0, %v979_v0 }
 0x2bc   :  { %v312_v61 = vpop.f32.mrb[0].mxu1 }
 0x2bd   :  { %v313_v62 = vadd.f32 %v312_v61, %v229_v60  ;;  %v740_v63 = vpop.f32.mrb[1].mxu1  ;;  %v813_v61 = vld [vmem:[#allocation10 + $0x8] sm:$0xff]  }
 0x2be   :  { %v315_v1 = vpop.f32.mrb[2].mxu1  ;;  %v816_v63 = vld [vmem:[#allocation10 + $0x20] sm:$0xff]  }
 0x2bf   :  { %v316_v2 = vadd.f32 %v315_v1, %v229_v60  ;;  %319 = vadd.xlane.f32.xlu0 %v313_v62  ;;  %v741_v3 = vpop.f32.mrb[3].mxu1  ;;  %v325_v4 = vmul.f32 %v313_v62, %v313_v62  ;;  %v812_v60 = vld [vmem:[#allocation10] sm:$0xff]   ;;  %v817_v1 = vld [vmem:[#allocation10 + $0x28] sm:$0xff]  }
 0x2c0   :  { %763 = vmatpush3.bf16.msra.mxu1 %v812_v60  ;;  %v819_v3 = vld [vmem:[#allocation10 + $0x38] sm:$0xff]  }
 0x2c1   :  { %321 = vadd.xlane.f32.xlu1 %v316_v2  ;;  %v326_v6 = vmul.f32 %v316_v2, %v316_v2  ;;  %764 = vmatprep.subr.bf16.mxu1 %v979_v0 }
 0x2c3   :  { %327 = vadd.xlane.f32.xlu0 %v325_v4 }
 0x2c4   :  { %765 = vmatpush3.bf16.msra.mxu1 %v813_v61 }
 0x2c5   :  { %329 = vadd.xlane.f32.xlu1 %v326_v6  ;;  %766 = vmatprep.subr.bf16.mxu1 %v979_v0 }
 0x2c8   :  { %767 = vmatpush3.bf16.msra.mxu1 %v814_v5 }
 0x2c9   :  { %768 = vmatprep.subr.bf16.mxu1 %v979_v0 }
 0x34c   :  { %v320_v15 = vpop.xlane.xlu0 %319 }
 0x34d   :  { %v323_v16 = vmul.f32 0.03125, %v320_v15 }
 0x34e   :  { %v322_v17 = vpop.xlane.xlu1 %321 }
 0x34f   :  { %v324_v18 = vmul.f32 0.03125, %v322_v17  ;;  %v333_v20 = vmul.f32 %v323_v16, %v323_v16  ;;  %v339_v32 = vsub.f32 %v313_v62, %v323_v16  ;;  %v815_v62 = vld [vmem:[#allocation10 + $0x18] sm:$0xff]  }
 0x350   :  { %v328_v19 = vpop.xlane.xlu0 %327  ;;  %769 = vmatpush3.bf16.msra.mxu1 %v815_v62 }
 0x351   :  { %v331_v21 = vmul.f32 0.03125, %v328_v19  ;;  %v334_v23 = vmul.f32 %v324_v18, %v324_v18  ;;  %v340_v35 = vsub.f32 %v316_v2, %v324_v18  ;;  %770 = vmatprep.subr.bf16.mxu1 %v979_v0  ;;  %v818_v2 = vld [vmem:[#allocation10 + $0x30] sm:$0xff]  }
 0x352   :  { %v330_v22 = vpop.xlane.xlu1 %329 }
 0x353   :  { %v335_v24 = vsub.f32 %v331_v21, %v333_v20  ;;  %v332_v25 = vmul.f32 0.03125, %v330_v22 }
 0x354   :  { %771 = vmatpush3.bf16.msra.mxu1 %v816_v63 }
 0x355   :  { %v337_v26 = vmax.f32 %v335_v24, 0.0  ;;  %v336_v27 = vsub.f32 %v332_v25, %v334_v23  ;;  %772 = vmatprep.subr.bf16.mxu1 %v979_v0  ;;  %v514_v23 = vrot.slane %v669_v50, %v1138_v41 }
 0x357   :  { %v341_v28 = vadd.f32 1e-05, %v337_v26  ;;  %v338_v29 = vmax.f32 %v336_v27, 0.0 }
 0x358   :  { %773 = vmatpush3.bf16.msra.mxu1 %v817_v1 }
 0x359   :  { %824 = vrsqrt.f32 %v341_v28  ;;  %v342_v30 = vadd.f32 1e-05, %v338_v29  ;;  %774 = vmatprep.subr.bf16.mxu1 %v979_v0 }
 0x35b   :  { %826 = vrsqrt.f32 %v342_v30 }
 0x35c   :  { %775 = vmatpush3.bf16.msra.mxu1 %v818_v2 }
 0x35d   :  { %776 = vmatprep.subr.bf16.mxu1 %v979_v0  ;;  %v508_v0 = vrot.slane %v669_v50, %v1136_v40  ;;  %v678_v40 = vld [vmem:[%s1191_s6] ss:$0 sm:$0xff] }
 0x360   :  { %777 = vmatpush3.bf16.msra.mxu1 %v819_v3 }
 0x363   :  { %v825_v33 = vpop.eup %824 }
 0x364   :  { %v345_v36 = vmul.f32 %v825_v33, %v339_v32 }
 0x365   :  { %v827_v37 = vpop.eup %826 }
 0x366   :  { %v346_v38 = vmul.f32 %v827_v37, %v340_v35  ;;  %v351_v39 = vmul.f32 %v350_v31, %v345_v36 }
 0x368   :  { %v352_v42 = vmul.f32 %v350_v31, %v346_v38  ;;  %v357_v43 = vadd.f32 %v356_v34, %v351_v39 }
 0x36a   :  { %v358_v44 = vadd.f32 %v356_v34, %v352_v42  ;;  %v361_v45 = vmul.f32 0.01, %v357_v43  ;;  %vm359_vm4 = vcmp.ge.f32.partialorder %v357_v43, 0.0 }
 0x36c   :  { %vm360_vm5 = vcmp.ge.f32.partialorder %v358_v44, 0.0  ;;  %v362_v46 = vmul.f32 0.01, %v358_v44  ;;  %v363_v47 = vsel %vm359_vm4, %v357_v43, %v361_v45 }
 0x36e   :  { %v364_v48 = vsel %vm360_vm5, %v358_v44, %v362_v46 }
 0x36f   :  { %v365_v49 = vpack.c.bf16 %v364_v48, %v363_v47 }
 0x371   :  { %759 = vmatmul.mubr.bf16.vlgmr.msra.gmra.mrb[4].mxu0 %v365_v49 }
 0x444   :  { %v470_v52 = vpop.f32.mrb[4].mxu0 }
 0x445   :  { %v471_v53 = vadd.f32 %v470_v52, %v387_v51  ;;  %v760_v54 = vpop.f32.mrb[5].mxu0 }
 0x446   :  { %v473_v55 = vpop.f32.mrb[6].mxu0 }
 0x447   :  { %v474_v56 = vadd.f32 %v473_v55, %v387_v51  ;;  %477 = vadd.xlane.f32.xlu0 %v471_v53  ;;  %v761_v57 = vpop.f32.mrb[7].mxu0  ;;  %v483_v58 = vmul.f32 %v471_v53, %v471_v53 }
 0x449   :  { %479 = vadd.xlane.f32.xlu1 %v474_v56  ;;  %v484_v59 = vmul.f32 %v474_v56, %v474_v56 }
 0x44b   :  { %485 = vadd.xlane.f32.xlu0 %v483_v58 }
 0x44d   :  { %487 = vadd.xlane.f32.xlu1 %v484_v59 }
 0x4d4   :  { %v478_v4 = vpop.xlane.xlu0 %477 }
 0x4d5   :  { %v481_v6 = vmul.f32 0.03125, %v478_v4 }
 0x4d6   :  { %v480_v7 = vpop.xlane.xlu1 %479 }
 0x4d7   :  { %v482_v8 = vmul.f32 0.03125, %v480_v7  ;;  %v491_v10 = vmul.f32 %v481_v6, %v481_v6  ;;  %v497_v21 = vsub.f32 %v471_v53, %v481_v6 }
 0x4d8   :  { %v486_v9 = vpop.xlane.xlu0 %485 }
 0x4d9   :  { %v489_v11 = vmul.f32 0.03125, %v486_v9  ;;  %v492_v13 = vmul.f32 %v482_v8, %v482_v8  ;;  %v498_v24 = vsub.f32 %v474_v56, %v482_v8 }
 0x4da   :  { %v488_v12 = vpop.xlane.xlu1 %487 }
 0x4db   :  { %v493_v14 = vsub.f32 %v489_v11, %v491_v10  ;;  %v490_v15 = vmul.f32 0.03125, %v488_v12 }
 0x4dd   :  { %v495_v16 = vmax.f32 %v493_v14, 0.0  ;;  %v494_v17 = vsub.f32 %v490_v15, %v492_v13 }
 0x4df   :  { %v499_v18 = vadd.f32 1e-05, %v495_v16  ;;  %v496_v19 = vmax.f32 %v494_v17, 0.0 }
 0x4e1   :  { %828 = vrsqrt.f32 %v499_v18  ;;  %v500_v20 = vadd.f32 1e-05, %v496_v19 }
 0x4e3   :  { %830 = vrsqrt.f32 %v500_v20 }
 0x4eb   :  { %v829_v22 = vpop.eup %828 }
 0x4ec   :  { %v503_v25 = vmul.f32 %v829_v22, %v497_v21 }
 0x4ed   :  { %v831_v26 = vpop.eup %830 }
 0x4ee   :  { %v504_v27 = vmul.f32 %v831_v26, %v498_v24  ;;  %v509_v28 = vmul.f32 %v508_v0, %v503_v25 }
 0x4f0   :  { %v510_v29 = vmul.f32 %v508_v0, %v504_v27  ;;  %v515_v30 = vadd.f32 %v514_v23, %v509_v28 }
 0x4f2   :  { %v516_v31 = vadd.f32 %v514_v23, %v510_v29  ;;  %v519_v32 = vmul.f32 0.01, %v515_v30  ;;  %vm517_vm6 = vcmp.ge.f32.partialorder %v515_v30, 0.0 }
 0x4f4   :  { %vm518_vm7 = vcmp.ge.f32.partialorder %v516_v31, 0.0  ;;  %v520_v33 = vmul.f32 0.01, %v516_v31  ;;  %v521_v34 = vsel %vm517_vm6, %v515_v30, %v519_v32 }
 0x4f6   :  { %v522_v35 = vsel %vm518_vm7, %v516_v31, %v520_v33 }
 0x4f7   :  { %v523_v36 = vpack.c.bf16 %v522_v35, %v521_v34 }
 0x4f9   :  { %779 = vmatmul.mubr.bf16.vlgmr.msra.gmra.mrb[4].mxu1 %v523_v36 }
 0x5cc   :  { %v629_v41 = vpop.f32.mrb[4].mxu1 }
 0x5cd   :  { %v630_v37 = vadd.f32 %v678_v40, %v629_v41  ;;  %v780_v38 = vpop.f32.mrb[5].mxu1 }
 0x5ce   :  { %v632_v39 = vpop.f32.mrb[6].mxu1 }
 0x5cf   :  { %636 = vst [vmem:[#allocation11] sm:$0xff] %v630_v37  ;;  %v633_v42 = vadd.f32 %v678_v40, %v632_v39  ;;  %v781_v43 = vpop.f32.mrb[7].mxu1 }
 0x5d1   :  { %637 = vst [vmem:[#allocation11 + $0x8] sm:$0xff] %v633_v42 }
 0x5d2   :  { %642 = vsyncadd [#allocation4], 128  ;;  %s981_s20 = smov [#allocation11]  }
 0x5d3   :  { %s643_s21 = sshll.u32 %s981_s20, 4  ;;  %s644_s21 = int_to_ptr.vmem [resolvable:$true] %s643_s21 }
 0x5d4   :  { %s942_s22 = scalar_lea.vmem %s644_s21, 128  ;;  %s946_s23 = scalar_lea.vmem %s644_s21, 256 }
 0x5d5   :  { %p943_p12 = scmp.ne.s32.totalorder %s644_s21, %s942_s22  ;;  %p947_p13 = scmp.lt.s32.totalorder %s644_s21, %s644_s21 }
 0x5d6   :  { %p948_p0 = scmp.lt.s32.totalorder %s946_s23, %s942_s22 }
 0x5d8   :  { %p949_p1 = por %p948_p0, %p947_p13 }
 0x5da   :  { %p950_p2 = pnand %p949_p1, %p943_p12 }
 0x5dc   :  { %953 = shalt.err (!%p950_p2)
}
 0x5dd   :  { %s954_s1 = scalar_lea.hbm %s1192_s7, 128 }
 0x5de   :  { %p955_p3 = scmp.ne.s32.totalorder %s1192_s7, %s954_s1  ;;  %p958_p4 = scmp.lt.u32.totalorder %s954_s1, %s1192_s7 }
 0x5e0   :  { %p960_p5 = pnand %p958_p4, %p955_p3 }
 0x5e2   :  { %963 = shalt.err (!%p960_p5)
}
 0x5e3   :  { %s982_s29 = smov 128   ;;  %s983_s8 = smov 8  }
 0x5e4   :  { %649 = dma.vmem_to_hbm [thread:$0]  %s644_s21, 128, %s1192_s7, [#allocation4], %s982_s29, %s982_s29, %s983_s8  }
 0x5e5   :  { %970 = dma.done.wait [#allocation4], 256  }
 0x5e6   :  { %971 = vsyncadd [#allocation4], 4294967040 }
 0x5e7   :  { %653 = vsyncpa [#allocation3], 1 }
 0x5e8   :  { %654 = vsyncpa [#allocation6], 1 }
 0x5e9   :  { %655 = vsyncpa [#allocation9], 1 }
 0x5ea   :  { %656 = vsyncpa [#allocation4], 1 }

// kernel: tpu_custom_call.1
= control target key start
LH: loop header
LB: loop body
LE: loop exit
PB: predicated region body
PF: predicated region fallthrough
CT: control target
= control target key end

     0   :  { %12 = vsyncpa [#allocation3], 0  ;;  %s1185_s0 = inlined_call_operand.hbm [shape: bf16[8,16], index: 0, kind: input, shape index: {}]   ;;  %s1186_s1 = inlined_call_operand.hbm [shape: bf16[16,128], index: 1, kind: input, shape index: {}]   ;;  %s1187_s2 = inlined_call_operand.hbm [shape: bf16[128,128], index: 2, kind: input, shape index: {}]   ;;  %s1188_s3 = inlined_call_operand.hbm [shape: bf16[128,128], index: 3, kind: input, shape index: {}]   ;;  %s1189_s4 = inlined_call_operand.vmem [shape: f32[3,3,128], index: 4, kind: input, shape index: {}]   ;;  %s1190_s5 = inlined_call_operand.hbm [shape: bf16[128,128], index: 5, kind: input, shape index: {}]   ;;  %s1191_s6 = inlined_call_operand.vmem [shape: f32[1,128], index: 6, kind: input, shape index: {}]   ;;  %s1192_s7 = inlined_call_operand.hbm [shape: f32[8,128], index: 7, kind: output, shape index: {}]  }
   0x1   :  { %13 = vsyncpa [#allocation6], 0 }
   0x2   :  { %14 = vsyncpa [#allocation9], 0 }
   0x3   :  { %15 = vsyncpa [#allocation4], 0 }
   0x4   :  { %20 = vsyncadd [#allocation3], 64  ;;  %s972_s24 = smov [#allocation5]   ;;  %s973_s26 = smov [#allocation8]  }
   0x5   :  { %s33_s25 = sshll.u32 %s972_s24, 4  ;;  %s57_s27 = sshll.u32 %s973_s26, 4  ;;  %s34_s25 = int_to_ptr.vmem [resolvable:$true] %s33_s25  ;;  %s1024_s27 = int_to_ptr.vmem [resolvable:$true] %s57_s27 }
   0x6   :  { %s832_s30 = scalar_lea.hbm %s1186_s1, 128 }
   0x7   :  { %p833_p0 = scmp.ne.s32.totalorder %s1186_s1, %s832_s30  ;;  %p836_p1 = scmp.lt.u32.totalorder %s832_s30, %s1186_s1 }
   0x9   :  { %p838_p2 = pnand %p836_p1, %p833_p0 }
   0xb   :  { %841 = shalt.err (!%p838_p2)
}
   0xc   :  { %s842_s12 = scalar_lea.vmem %s34_s25, 128  ;;  %p847_p4 = scmp.lt.s32.totalorder %s34_s25, %s34_s25 }
   0xd   :  { %p843_p3 = scmp.ne.s32.totalorder %s34_s25, %s842_s12  ;;  %p848_p5 = scmp.lt.s32.totalorder %s842_s12, %s842_s12 }
   0xf   :  { %p849_p6 = por %p848_p5, %p847_p4 }
  0x11   :  { %p850_p7 = pnand %p849_p6, %p843_p3 }
  0x13   :  { %853 = shalt.err (!%p850_p7)
}
  0x14   :  { %s974_s13 = smov 64   ;;  %s975_s14 = smov 4  }
  0x15   :  { %39 = dma.hbm_to_vmem [thread:$0]  %s1186_s1, 128, %s34_s25, [#allocation6], %s974_s13, %s974_s13, %s975_s14  }
  0x16   :  { %s854_s19 = scalar_lea.hbm %s1188_s3, 1024 }
  0x17   :  { %p855_p8 = scmp.ne.s32.totalorder %s1188_s3, %s854_s19  ;;  %p858_p9 = scmp.lt.u32.totalorder %s854_s19, %s1188_s3 }
  0x19   :  { %p860_p10 = pnand %p858_p9, %p855_p8 }
  0x1b   :  { %863 = shalt.err (!%p860_p10)
}
  0x1c   :  { %s864_s24 = scalar_lea.vmem %s1024_s27, 1024  ;;  %p869_p12 = scmp.lt.s32.totalorder %s1024_s27, %s1024_s27 }
  0x1d   :  { %p865_p11 = scmp.ne.s32.totalorder %s1024_s27, %s864_s24  ;;  %p870_p13 = scmp.lt.s32.totalorder %s864_s24, %s864_s24 }
  0x1f   :  { %p871_p0 = por %p870_p13, %p869_p12 }
  0x21   :  { %p872_p1 = pnand %p871_p0, %p865_p11 }
  0x23   :  { %875 = shalt.err (!%p872_p1)
}
  0x24   :  { %63 = dma.hbm_to_vmem [thread:$0]  %s1188_s3, 1024, %s1024_s27, [#allocation9], %s974_s13, %s974_s13, %s975_s14  }
  0x25   :  { %s976_s26 = smov [#allocation2]   ;;  %s977_s29 = smov [#allocation7]  }
  0x26   :  { %s21_s28 = sshll.u32 %s976_s26, 4  ;;  %s45_s30 = sshll.u32 %s977_s29, 4  ;;  %s22_s28 = int_to_ptr.vmem [resolvable:$true] %s21_s28  ;;  %s1061_s30 = int_to_ptr.vmem [resolvable:$true] %s45_s30 }
  0x27   :  { %s876_s10 = scalar_lea.hbm %s1185_s0, 64 }
  0x28   :  { %p877_p2 = scmp.ne.s32.totalorder %s1185_s0, %s876_s10  ;;  %p880_p3 = scmp.lt.u32.totalorder %s876_s10, %s1185_s0 }
  0x2a   :  { %p882_p4 = pnand %p880_p3, %p877_p2 }
  0x2c   :  { %885 = shalt.err (!%p882_p4)
}
  0x2d   :  { %s886_s3 = scalar_lea.vmem %s22_s28, 64  ;;  %s890_s27 = scalar_lea.vmem %s22_s28, 128 }
  0x2e   :  { %p887_p5 = scmp.ne.s32.totalorder %s22_s28, %s886_s3  ;;  %p891_p6 = scmp.lt.s32.totalorder %s22_s28, %s22_s28 }
  0x2f   :  { %p892_p7 = scmp.lt.s32.totalorder %s890_s27, %s886_s3 }
  0x31   :  { %p893_p8 = por %p892_p7, %p891_p6 }
  0x33   :  { %p894_p9 = pnand %p893_p8, %p887_p5 }
  0x35   :  { %897 = shalt.err (!%p894_p9)
}
  0x36   :  { %27 = dma.hbm_to_vmem [thread:$0]  %s1185_s0, 64, %s22_s28, [#allocation3], %s974_s13, %s974_s13, %s975_s14  }
  0x37   :  { %s898_s21 = scalar_lea.hbm %s1187_s2, 1024 }
  0x38   :  { %p899_p10 = scmp.ne.s32.totalorder %s1187_s2, %s898_s21  ;;  %p902_p11 = scmp.lt.u32.totalorder %s898_s21, %s1187_s2 }
  0x3a   :  { %p904_p12 = pnand %p902_p11, %p899_p10 }
  0x3c   :  { %907 = shalt.err (!%p904_p12)
}
  0x3d   :  { %s908_s25 = scalar_lea.vmem %s1061_s30, 1024  ;;  %p913_p0 = scmp.lt.s32.totalorder %s1061_s30, %s1061_s30 }
  0x3e   :  { %p909_p13 = scmp.ne.s32.totalorder %s1061_s30, %s908_s25  ;;  %p914_p1 = scmp.lt.s32.totalorder %s908_s25, %s908_s25 }
  0x40   :  { %p915_p2 = por %p914_p1, %p913_p0 }
  0x42   :  { %p916_p3 = pnand %p915_p2, %p909_p13 }
  0x44   :  { %919 = shalt.err (!%p916_p3)
}
  0x45   :  { %51 = dma.hbm_to_vmem [thread:$0]  %s1187_s2, 1024, %s1061_s30, [#allocation6], %s974_s13, %s974_s13, %s975_s14  }
  0x46   :  { %s978_s28 = smov [#allocation10]   ;;  %s920_s10 = scalar_lea.hbm %s1190_s5, 1024 }
  0x47   :  { %s71_s29 = sshll.u32 %s978_s28, 4  ;;  %p921_p4 = scmp.ne.s32.totalorder %s1190_s5, %s920_s10  ;;  %s72_s29 = int_to_ptr.vmem [resolvable:$true] %s71_s29 }
  0x48   :  { %p924_p5 = scmp.lt.u32.totalorder %s920_s10, %s1190_s5 }
  0x4a   :  { %p926_p6 = pnand %p924_p5, %p921_p4 }
  0x4c   :  { %929 = shalt.err (!%p926_p6)
}
  0x4d   :  { %s930_s3 = scalar_lea.vmem %s72_s29, 1024  ;;  %p935_p8 = scmp.lt.s32.totalorder %s72_s29, %s72_s29 }
  0x4e   :  { %p931_p7 = scmp.ne.s32.totalorder %s72_s29, %s930_s3  ;;  %p936_p9 = scmp.lt.s32.totalorder %s930_s3, %s930_s3 }
  0x50   :  { %p937_p10 = por %p936_p9, %p935_p8 }
  0x52   :  { %p938_p11 = pnand %p937_p10, %p931_p7 }
  0x54   :  { %941 = shalt.err (!%p938_p11)
}
  0x55   :  { %77 = dma.hbm_to_vmem [thread:$0]  %s1190_s5, 1024, %s72_s29, [#allocation9], %s974_s13, %s974_s13, %s975_s14  }
  0x56   :  { %964 = dma.done.wait [#allocation3], 128  }
  0x57   :  { %965 = vsyncadd [#allocation3], 4294967168 }
  0x58   :  { %966 = dma.done.wait [#allocation6], 1152  }
  0x59   :  { %967 = vsyncadd [#allocation6], 4294966144 }
  0x5a   :  { %968 = dma.done.wait [#allocation9], 2048  }
  0x5b   :  { %969 = vsyncadd [#allocation9], 4294965248  ;;  %v979_v0 = vmov 0.0   ;;  %vm980_vm0 = vmmov 0   ;;  %v794_v1 = vld [vmem:[#allocation5] sm:$0xff]   ;;  %v795_v2 = vld [vmem:[#allocation2] sm:$0xff]   ;;  %v101_v3 = vlaneseq }
  0x5c   :  { %716 = vmatprep.subr.bf16.mxu0 %v979_v0  ;;  %718 = vmatprep.mubr.msk.bf16.mxu0 %vm980_vm0, %v979_v0  ;;  %vm116_vm1 = vcmask 130048   ;;  %v100_v6 = vld [vmem:[%s1189_s4] sm:$0x7]  ;;  %v797_v17 = vld [vmem:[#allocation7 + $0x8] sm:$0xff]   ;;  %v798_v18 = vld [vmem:[#allocation7 + $0x10] sm:$0xff]  }
  0x5d   :  { %722 = vmatprep.subr.bf16.mxu1 %v979_v0  ;;  %738 = vmatprep.mubr.msk.bf16.mxu1 %vm980_vm0, %v979_v0  ;;  %v102_v4 = vshrl.u32 %v101_v3, 7  ;;  %v796_v16 = vld [vmem:[#allocation7] sm:$0xff]   ;;  %v799_v19 = vld [vmem:[#allocation7 + $0x18] sm:$0xff]   ;;  %v801_v21 = vld [vmem:[#allocation7 + $0x28] sm:$0xff]  }
  0x5e   :  { %717 = vmatpush3.bf16.msra.mxu0 %v794_v1  ;;  %723 = vmatpush3.bf16.msra.mxu1 %v796_v16  ;;  %v800_v20 = vld [vmem:[#allocation7 + $0x20] sm:$0xff]   ;;  %v802_v22 = vld [vmem:[#allocation7 + $0x30] sm:$0xff]   ;;  %v803_v23 = vld [vmem:[#allocation7 + $0x38] sm:$0xff]  }
  0x5f   :  { %742 = vmatprep.subr.bf16.mxu0 %v979_v0  ;;  %v1122_v5 = vsub.s32 0, %v102_v4  ;;  %724 = vmatprep.subr.bf16.mxu1 %v979_v0  ;;  %v1136_v40 = vsub.s32 1, %v102_v4  ;;  %v1138_v41 = vsub.s32 2, %v102_v4  ;;  %v660_v59 = vld [vmem:[%s1189_s4 + $0x4] sm:$0x7] }
  0x61   :  { %719 = vmatmul.mubr.msk.bf16.vlgmr.msra.gmra.mrb[0].mxu0 %vm116_vm1, %v795_v2  ;;  %v104_v7 = vrot.slane %v100_v6, %v1122_v5  ;;  %v192_v42 = vrot.slane %v100_v6, %v1136_v40  ;;  %v198_v45 = vrot.slane %v100_v6, %v1138_v41  ;;  %v229_v60 = vrot.slane %v660_v59, %v1122_v5 }
  0x62   :  { %758 = vmatprep.mubr.msk.bf16.mxu0 %vm980_vm0, %v979_v0  ;;  %725 = vmatpush3.bf16.msra.mxu1 %v797_v17 }
  0x63   :  { %726 = vmatprep.subr.bf16.mxu1 %v979_v0 }
  0x66   :  { %727 = vmatpush3.bf16.msra.mxu1 %v798_v18 }
  0x67   :  { %728 = vmatprep.subr.bf16.mxu1 %v979_v0 }
  0x6a   :  { %729 = vmatpush3.bf16.msra.mxu1 %v799_v19 }
  0x6b   :  { %730 = vmatprep.subr.bf16.mxu1 %v979_v0 }
  0x6e   :  { %731 = vmatpush3.bf16.msra.mxu1 %v800_v20 }
  0x6f   :  { %732 = vmatprep.subr.bf16.mxu1 %v979_v0 }
  0x72   :  { %733 = vmatpush3.bf16.msra.mxu1 %v801_v21 }
  0x73   :  { %734 = vmatprep.subr.bf16.mxu1 %v979_v0 }
  0x76   :  { %735 = vmatpush3.bf16.msra.mxu1 %v802_v22 }
  0x77   :  { %736 = vmatprep.subr.bf16.mxu1 %v979_v0 }
  0x7a   :  { %737 = vmatpush3.bf16.msra.mxu1 %v803_v23 }
  0x7b   :  { %762 = vmatprep.subr.bf16.mxu1 %v979_v0 }
 0x134   :  { %v154_v8 = vpop.f32.mrb[0].mxu0 }
 0x135   :  { %v155_v9 = vadd.f32 %v154_v8, %v104_v7  ;;  %v720_v10 = vpop.f32.mrb[1].mxu0  ;;  %v805_v8 = vld [vmem:[#allocation8 + $0x8] sm:$0xff]  }
 0x136   :  { %v157_v11 = vpop.f32.mrb[2].mxu0  ;;  %v807_v10 = vld [vmem:[#allocation8 + $0x18] sm:$0xff]  }
 0x137   :  { %v158_v12 = vadd.f32 %v157_v11, %v104_v7  ;;  %161 = vadd.xlane.f32.xlu0 %v155_v9  ;;  %v721_v13 = vpop.f32.mrb[3].mxu0  ;;  %v167_v14 = vmul.f32 %v155_v9, %v155_v9  ;;  %v804_v7 = vld [vmem:[#allocation8] sm:$0xff]  }
 0x138   :  { %743 = vmatpush3.bf16.msra.mxu0 %v804_v7  ;;  %v808_v11 = vld [vmem:[#allocation8 + $0x20] sm:$0xff]   ;;  %v810_v13 = vld [vmem:[#allocation8 + $0x30] sm:$0xff]  }
 0x139   :  { %169 = vadd.xlane.f32.xlu1 %v167_v14  ;;  %v168_v15 = vmul.f32 %v158_v12, %v158_v12  ;;  %744 = vmatprep.subr.bf16.mxu0 %v979_v0  ;;  %v811_v14 = vld [vmem:[#allocation8 + $0x38] sm:$0xff]  }
 0x13b   :  { %163 = vadd.xlane.f32.xlu0 %v158_v12 }
 0x13c   :  { %745 = vmatpush3.bf16.msra.mxu0 %v805_v8 }
 0x13d   :  { %171 = vadd.xlane.f32.xlu1 %v168_v15  ;;  %746 = vmatprep.subr.bf16.mxu0 %v979_v0 }
 0x1c4   :  { %v162_v24 = vpop.xlane.xlu0 %161 }
 0x1c5   :  { %v165_v25 = vmul.f32 0.03125, %v162_v24 }
 0x1c6   :  { %v170_v26 = vpop.xlane.xlu1 %169 }
 0x1c7   :  { %v175_v27 = vmul.f32 %v165_v25, %v165_v25  ;;  %v173_v28 = vmul.f32 0.03125, %v170_v26  ;;  %v181_v43 = vsub.f32 %v155_v9, %v165_v25  ;;  %v806_v9 = vld [vmem:[#allocation8 + $0x10] sm:$0xff]  }
 0x1c8   :  { %v164_v29 = vpop.xlane.xlu0 %163  ;;  %747 = vmatpush3.bf16.msra.mxu0 %v806_v9 }
 0x1c9   :  { %v177_v30 = vsub.f32 %v173_v28, %v175_v27  ;;  %v166_v31 = vmul.f32 0.03125, %v164_v29  ;;  %748 = vmatprep.subr.bf16.mxu0 %v979_v0 }
 0x1ca   :  { %v172_v32 = vpop.xlane.xlu1 %171 }
 0x1cb   :  { %v179_v33 = vmax.f32 %v177_v30, 0.0  ;;  %v176_v34 = vmul.f32 %v166_v31, %v166_v31  ;;  %v174_v35 = vmul.f32 0.03125, %v172_v32  ;;  %v182_v47 = vsub.f32 %v158_v12, %v166_v31  ;;  %v809_v12 = vld [vmem:[#allocation8 + $0x28] sm:$0xff]  }
 0x1cc   :  { %749 = vmatpush3.bf16.msra.mxu0 %v807_v10  ;;  %v350_v31 = vrot.slane %v660_v59, %v1136_v40 }
 0x1cd   :  { %v183_v36 = vadd.f32 1e-05, %v179_v33  ;;  %v178_v37 = vsub.f32 %v174_v35, %v176_v34  ;;  %750 = vmatprep.subr.bf16.mxu0 %v979_v0  ;;  %v356_v34 = vrot.slane %v660_v59, %v1138_v41 }
 0x1cf   :  { %820 = vrsqrt.f32 %v183_v36  ;;  %v180_v38 = vmax.f32 %v178_v37, 0.0 }
 0x1d0   :  { %751 = vmatpush3.bf16.msra.mxu0 %v808_v11 }
 0x1d1   :  { %v184_v39 = vadd.f32 1e-05, %v180_v38  ;;  %752 = vmatprep.subr.bf16.mxu0 %v979_v0 }
 0x1d3   :  { %822 = vrsqrt.f32 %v184_v39 }
 0x1d4   :  { %753 = vmatpush3.bf16.msra.mxu0 %v809_v12 }
 0x1d5   :  { %754 = vmatprep.subr.bf16.mxu0 %v979_v0 }
 0x1d8   :  { %755 = vmatpush3.bf16.msra.mxu0 %v810_v13 }
 0x1d9   :  { %v821_v44 = vpop.eup %820  ;;  %756 = vmatprep.subr.bf16.mxu0 %v979_v0 }
 0x1da   :  { %v187_v46 = vmul.f32 %v821_v44, %v181_v43 }
 0x1dc   :  { %v193_v48 = vmul.f32 %v192_v42, %v187_v46  ;;  %757 = vmatpush3.bf16.msra.mxu0 %v811_v14 }
 0x1dd   :  { %v823_v49 = vpop.eup %822 }
 0x1de   :  { %v188_v50 = vmul.f32 %v823_v49, %v182_v47  ;;  %v199_v51 = vadd.f32 %v198_v45, %v193_v48 }
 0x1e0   :  { %v194_v52 = vmul.f32 %v192_v42, %v188_v50  ;;  %v203_v54 = vmul.f32 0.01, %v199_v51  ;;  %vm201_vm2 = vcmp.ge.f32.partialorder %v199_v51, 0.0  ;;  %v669_v50 = vld [vmem:[%s1189_s4 + $0x8] sm:$0x7] }
 0x1e2   :  { %v200_v53 = vadd.f32 %v198_v45, %v194_v52  ;;  %v205_v56 = vsel %vm201_vm2, %v199_v51, %v203_v54  ;;  %v387_v51 = vrot.slane %v669_v50, %v1122_v5  ;;  %v814_v5 = vld [vmem:[#allocation10 + $0x10] sm:$0xff]  }
 0x1e4   :  { %vm202_vm3 = vcmp.ge.f32.partialorder %v200_v53, 0.0  ;;  %v204_v55 = vmul.f32 0.01, %v200_v53 }
 0x1e6   :  { %v206_v57 = vsel %vm202_vm3, %v200_v53, %v204_v55 }
 0x1e7   :  { %v207_v58 = vpack.c.bf16 %v206_v57, %v205_v56 }
 0x1e9   :  { %739 = vmatmul.mubr.bf16.vlgmr.msra.gmra.mrb[0].mxu1 %v207_v58 }
 0x1ea   :  { %778 = vmatprep.mubr.msk.bf16.mxu1 %vm980_vm0, %v979_v0 }
 0x2bc   :  { %v312_v61 = vpop.f32.mrb[0].mxu1 }
 0x2bd   :  { %v313_v62 = vadd.f32 %v312_v61, %v229_v60  ;;  %v740_v63 = vpop.f32.mrb[1].mxu1  ;;  %v813_v61 = vld [vmem:[#allocation10 + $0x8] sm:$0xff]  }
 0x2be   :  { %v315_v1 = vpop.f32.mrb[2].mxu1  ;;  %v816_v63 = vld [vmem:[#allocation10 + $0x20] sm:$0xff]  }
 0x2bf   :  { %v316_v2 = vadd.f32 %v315_v1, %v229_v60  ;;  %319 = vadd.xlane.f32.xlu0 %v313_v62  ;;  %v741_v3 = vpop.f32.mrb[3].mxu1  ;;  %v325_v4 = vmul.f32 %v313_v62, %v313_v62  ;;  %v812_v60 = vld [vmem:[#allocation10] sm:$0xff]   ;;  %v817_v1 = vld [vmem:[#allocation10 + $0x28] sm:$0xff]  }
 0x2c0   :  { %763 = vmatpush3.bf16.msra.mxu1 %v812_v60  ;;  %v819_v3 = vld [vmem:[#allocation10 + $0x38] sm:$0xff]  }
 0x2c1   :  { %321 = vadd.xlane.f32.xlu1 %v316_v2  ;;  %v326_v6 = vmul.f32 %v316_v2, %v316_v2  ;;  %764 = vmatprep.subr.bf16.mxu1 %v979_v0 }
 0x2c3   :  { %327 = vadd.xlane.f32.xlu0 %v325_v4 }
 0x2c4   :  { %765 = vmatpush3.bf16.msra.mxu1 %v813_v61 }
 0x2c5   :  { %329 = vadd.xlane.f32.xlu1 %v326_v6  ;;  %766 = vmatprep.subr.bf16.mxu1 %v979_v0 }
 0x2c8   :  { %767 = vmatpush3.bf16.msra.mxu1 %v814_v5 }
 0x2c9   :  { %768 = vmatprep.subr.bf16.mxu1 %v979_v0 }
 0x34c   :  { %v320_v15 = vpop.xlane.xlu0 %319 }
 0x34d   :  { %v323_v16 = vmul.f32 0.03125, %v320_v15 }
 0x34e   :  { %v322_v17 = vpop.xlane.xlu1 %321 }
 0x34f   :  { %v324_v18 = vmul.f32 0.03125, %v322_v17  ;;  %v333_v20 = vmul.f32 %v323_v16, %v323_v16  ;;  %v339_v32 = vsub.f32 %v313_v62, %v323_v16  ;;  %v815_v62 = vld [vmem:[#allocation10 + $0x18] sm:$0xff]  }
 0x350   :  { %v328_v19 = vpop.xlane.xlu0 %327  ;;  %769 = vmatpush3.bf16.msra.mxu1 %v815_v62 }
 0x351   :  { %v331_v21 = vmul.f32 0.03125, %v328_v19  ;;  %v334_v23 = vmul.f32 %v324_v18, %v324_v18  ;;  %v340_v35 = vsub.f32 %v316_v2, %v324_v18  ;;  %770 = vmatprep.subr.bf16.mxu1 %v979_v0  ;;  %v818_v2 = vld [vmem:[#allocation10 + $0x30] sm:$0xff]  }
 0x352   :  { %v330_v22 = vpop.xlane.xlu1 %329 }
 0x353   :  { %v335_v24 = vsub.f32 %v331_v21, %v333_v20  ;;  %v332_v25 = vmul.f32 0.03125, %v330_v22 }
 0x354   :  { %771 = vmatpush3.bf16.msra.mxu1 %v816_v63 }
 0x355   :  { %v337_v26 = vmax.f32 %v335_v24, 0.0  ;;  %v336_v27 = vsub.f32 %v332_v25, %v334_v23  ;;  %772 = vmatprep.subr.bf16.mxu1 %v979_v0  ;;  %v514_v23 = vrot.slane %v669_v50, %v1138_v41 }
 0x357   :  { %v341_v28 = vadd.f32 1e-05, %v337_v26  ;;  %v338_v29 = vmax.f32 %v336_v27, 0.0 }
 0x358   :  { %773 = vmatpush3.bf16.msra.mxu1 %v817_v1 }
 0x359   :  { %824 = vrsqrt.f32 %v341_v28  ;;  %v342_v30 = vadd.f32 1e-05, %v338_v29  ;;  %774 = vmatprep.subr.bf16.mxu1 %v979_v0 }
 0x35b   :  { %826 = vrsqrt.f32 %v342_v30 }
 0x35c   :  { %775 = vmatpush3.bf16.msra.mxu1 %v818_v2 }
 0x35d   :  { %776 = vmatprep.subr.bf16.mxu1 %v979_v0  ;;  %v508_v0 = vrot.slane %v669_v50, %v1136_v40  ;;  %v678_v40 = vld [vmem:[%s1191_s6] ss:$0 sm:$0xff] }
 0x360   :  { %777 = vmatpush3.bf16.msra.mxu1 %v819_v3 }
 0x363   :  { %v825_v33 = vpop.eup %824 }
 0x364   :  { %v345_v36 = vmul.f32 %v825_v33, %v339_v32 }
 0x365   :  { %v827_v37 = vpop.eup %826 }
 0x366   :  { %v346_v38 = vmul.f32 %v827_v37, %v340_v35  ;;  %v351_v39 = vmul.f32 %v350_v31, %v345_v36 }
 0x368   :  { %v352_v42 = vmul.f32 %v350_v31, %v346_v38  ;;  %v357_v43 = vadd.f32 %v356_v34, %v351_v39 }
 0x36a   :  { %v358_v44 = vadd.f32 %v356_v34, %v352_v42  ;;  %v361_v45 = vmul.f32 0.01, %v357_v43  ;;  %vm359_vm4 = vcmp.ge.f32.partialorder %v357_v43, 0.0 }
 0x36c   :  { %vm360_vm5 = vcmp.ge.f32.partialorder %v358_v44, 0.0  ;;  %v362_v46 = vmul.f32 0.01, %v358_v44  ;;  %v363_v47 = vsel %vm359_vm4, %v357_v43, %v361_v45 }
 0x36e   :  { %v364_v48 = vsel %vm360_vm5, %v358_v44, %v362_v46 }
 0x36f   :  { %v365_v49 = vpack.c.bf16 %v364_v48, %v363_v47 }
 0x371   :  { %759 = vmatmul.mubr.bf16.vlgmr.msra.gmra.mrb[4].mxu0 %v365_v49 }
 0x444   :  { %v470_v52 = vpop.f32.mrb[4].mxu0 }
 0x445   :  { %v471_v53 = vadd.f32 %v470_v52, %v387_v51  ;;  %v760_v54 = vpop.f32.mrb[5].mxu0 }
 0x446   :  { %v473_v55 = vpop.f32.mrb[6].mxu0 }
 0x447   :  { %v474_v56 = vadd.f32 %v473_v55, %v387_v51  ;;  %477 = vadd.xlane.f32.xlu0 %v471_v53  ;;  %v761_v57 = vpop.f32.mrb[7].mxu0  ;;  %v483_v58 = vmul.f32 %v471_v53, %v471_v53 }
 0x449   :  { %479 = vadd.xlane.f32.xlu1 %v474_v56  ;;  %v484_v59 = vmul.f32 %v474_v56, %v474_v56 }
 0x44b   :  { %485 = vadd.xlane.f32.xlu0 %v483_v58 }
 0x44d   :  { %487 = vadd.xlane.f32.xlu1 %v484_v59 }
 0x4d4   :  { %v478_v4 = vpop.xlane.xlu0 %477 }
 0x4d5   :  { %v481_v6 = vmul.f32 0.03125, %v478_v4 }
 0x4d6   :  { %v480_v7 = vpop.xlane.xlu1 %479 }
 0x4d7   :  { %v482_v8 = vmul.f32 0.03125, %v480_v7  ;;  %v491_v10 = vmul.f32 %v481_v6, %v481_v6  ;;  %v497_v21 = vsub.f32 %v471_v53, %v481_v6 }
 0x4d8   :  { %v486_v9 = vpop.xlane.xlu0 %485 }
 0x4d9   :  { %v489_v11 = vmul.f32 0.03125, %v486_v9  ;;  %v492_v13 = vmul.f32 %v482_v8, %v482_v8  ;;  %v498_v24 = vsub.f32 %v474_v56, %v482_v8 }
 0x4da   :  { %v488_v12 = vpop.xlane.xlu1 %487 }
 0x4db   :  { %v493_v14 = vsub.f32 %v489_v11, %v491_v10  ;;  %v490_v15 = vmul.f32 0.03125, %v488_v12 }
 0x4dd   :  { %v495_v16 = vmax.f32 %v493_v14, 0.0  ;;  %v494_v17 = vsub.f32 %v490_v15, %v492_v13 }
 0x4df   :  { %v499_v18 = vadd.f32 1e-05, %v495_v16  ;;  %v496_v19 = vmax.f32 %v494_v17, 0.0 }
 0x4e1   :  { %828 = vrsqrt.f32 %v499_v18  ;;  %v500_v20 = vadd.f32 1e-05, %v496_v19 }
 0x4e3   :  { %830 = vrsqrt.f32 %v500_v20 }
 0x4eb   :  { %v829_v22 = vpop.eup %828 }
 0x4ec   :  { %v503_v25 = vmul.f32 %v829_v22, %v497_v21 }
 0x4ed   :  { %v831_v26 = vpop.eup %830 }
 0x4ee   :  { %v504_v27 = vmul.f32 %v831_v26, %v498_v24  ;;  %v509_v28 = vmul.f32 %v508_v0, %v503_v25 }
 0x4f0   :  { %v510_v29 = vmul.f32 %v508_v0, %v504_v27  ;;  %v515_v30 = vadd.f32 %v514_v23, %v509_v28 }
 0x4f2   :  { %v516_v31 = vadd.f32 %v514_v23, %v510_v29  ;;  %v519_v32 = vmul.f32 0.01, %v515_v30  ;;  %vm517_vm6 = vcmp.ge.f32.partialorder %v515_v30, 0.0 }
 0x4f4   :  { %vm518_vm7 = vcmp.ge.f32.partialorder %v516_v31, 0.0  ;;  %v520_v33 = vmul.f32 0.01, %v516_v31  ;;  %v521_v34 = vsel %vm517_vm6, %v515_v30, %v519_v32 }
 0x4f6   :  { %v522_v35 = vsel %vm518_vm7, %v516_v31, %v520_v33 }
 0x4f7   :  { %v523_v36 = vpack.c.bf16 %v522_v35, %v521_v34 }
 0x4f9   :  { %779 = vmatmul.mubr.bf16.vlgmr.msra.gmra.mrb[4].mxu1 %v523_v36 }
 0x5cc   :  { %v629_v41 = vpop.f32.mrb[4].mxu1 }
 0x5cd   :  { %v630_v37 = vadd.f32 %v678_v40, %v629_v41  ;;  %v780_v38 = vpop.f32.mrb[5].mxu1 }
 0x5ce   :  { %v632_v39 = vpop.f32.mrb[6].mxu1 }
 0x5cf   :  { %636 = vst [vmem:[#allocation11] sm:$0xff] %v630_v37  ;;  %v633_v42 = vadd.f32 %v678_v40, %v632_v39  ;;  %v781_v43 = vpop.f32.mrb[7].mxu1 }
 0x5d1   :  { %637 = vst [vmem:[#allocation11 + $0x8] sm:$0xff] %v633_v42 }
 0x5d2   :  { %642 = vsyncadd [#allocation4], 128  ;;  %s981_s20 = smov [#allocation11]  }
 0x5d3   :  { %s643_s21 = sshll.u32 %s981_s20, 4  ;;  %s644_s21 = int_to_ptr.vmem [resolvable:$true] %s643_s21 }
 0x5d4   :  { %s942_s22 = scalar_lea.vmem %s644_s21, 128  ;;  %s946_s23 = scalar_lea.vmem %s644_s21, 256 }
 0x5d5   :  { %p943_p12 = scmp.ne.s32.totalorder %s644_s21, %s942_s22  ;;  %p947_p13 = scmp.lt.s32.totalorder %s644_s21, %s644_s21 }
 0x5d6   :  { %p948_p0 = scmp.lt.s32.totalorder %s946_s23, %s942_s22 }
 0x5d8   :  { %p949_p1 = por %p948_p0, %p947_p13 }
 0x5da   :  { %p950_p2 = pnand %p949_p1, %p943_p12 }
 0x5dc   :  { %953 = shalt.err (!%p950_p2)
}
 0x5dd   :  { %s954_s1 = scalar_lea.hbm %s1192_s7, 128 }
 0x5de   :  { %p955_p3 = scmp.ne.s32.totalorder %s1192_s7, %s954_s1  ;;  %p958_p4 = scmp.lt.u32.totalorder %s954_s1, %s1192_s7 }
 0x5e0   :  { %p960_p5 = pnand %p958_p4, %p955_p3 }
 0x5e2   :  { %963 = shalt.err (!%p960_p5)
}
 0x5e3   :  { %s982_s29 = smov 128   ;;  %s983_s8 = smov 8  }
 0x5e4   :  { %649 = dma.vmem_to_hbm [thread:$0]  %s644_s21, 128, %s1192_s7, [#allocation4], %s982_s29, %s982_s29, %s983_s8  }
 0x5e5   :  { %970 = dma.done.wait [#allocation4], 256  }
 0x5e6   :  { %971 = vsyncadd [#allocation4], 4294967040 }
 0x5e7   :  { %653 = vsyncpa [#allocation3], 1 }
 0x5e8   :  { %654 = vsyncpa [#allocation6], 1 }
 0x5e9   :  { %655 = vsyncpa [#allocation9], 1 }
 0x5ea   :  { %656 = vsyncpa [#allocation4], 1 }

</bundles_post_ra>
